<compile_context>
chip_gen: v7x
topology: tpu7x:2x2x1
jax: 0.10.0
libtpu: 0.0.40
codegen_flags: <defaults>
</compile_context>

<pallas_src>
import functools

import jax
import jax.numpy as jnp
from jax.experimental import pallas as pl
from jax.experimental.pallas import tpu as pltpu


def _intent_forward_kernel(
    x_ref,        # (T*B, 5)       time-major bbox rows augmented with a ones column
    w_embb_ref,   # (5, 272)       [W_emb^T ; b_emb] packed (bias as last row)
    w_ih_ref,     # (3, 272, H)    per-gate GRU input weights (r, z, n), pre-transposed
    w_hh_ref,     # (3, H, H)      per-gate GRU hidden weights (r, z, n), pre-transposed
    b_ref,        # (4, H)         [b_ih_r+b_hh_r, b_ih_z+b_hh_z, b_ih_n, b_hh_n]
    w_cls_ref,    # (H, 128)       classifier weight, zero-padded to 128 lanes
    b_cls_ref,    # (1, 128)       classifier bias,   zero-padded to 128 lanes
    out_ref,      # (T*B, 128)     intent scores (first 2 lanes valid)
    h_all_ref,    # (T*B, H)       VMEM scratch: hidden state per timestep
    *,
    seg_len,
    batch,
):
    f32 = jnp.float32
    hidden = w_hh_ref.shape[-1]

    # ---- Batched, time-independent work: embedding + input-side GRU gates for all t ----
    x = x_ref[...]                                                     # (T*B, 5)
    emb = jnp.maximum(
        jnp.dot(x, w_embb_ref[...], preferred_element_type=f32), 0.0)  # (T*B, 272)

    gi_r = jnp.dot(emb, w_ih_ref[0], preferred_element_type=f32) + b_ref[0:1, :]
    gi_z = jnp.dot(emb, w_ih_ref[1], preferred_element_type=f32) + b_ref[1:2, :]
    gi_n = jnp.dot(emb, w_ih_ref[2], preferred_element_type=f32) + b_ref[2:3, :]
    b_hn = b_ref[3:4, :]

    w_hh_r = w_hh_ref[0]
    w_hh_z = w_hh_ref[1]
    w_hh_n = w_hh_ref[2]

    # ---- Serial recurrence over time (statically unrolled; seg_len is small) ----
    h = jnp.zeros((batch, hidden), f32)
    for t in range(seg_len):
        lo, hi = t * batch, (t + 1) * batch
        r = jax.nn.sigmoid(gi_r[lo:hi] + jnp.dot(h, w_hh_r, preferred_element_type=f32))
        z = jax.nn.sigmoid(gi_z[lo:hi] + jnp.dot(h, w_hh_z, preferred_element_type=f32))
        n = jnp.tanh(
            gi_n[lo:hi] + r * (jnp.dot(h, w_hh_n, preferred_element_type=f32) + b_hn))
        h = (1.0 - z) * n + z * h
        h_all_ref[lo:hi, :] = h

    # ---- Batched classifier + single lane-dense store ----
    h_all = h_all_ref[...]                                             # (T*B, H)
    out_ref[...] = (
        jnp.dot(h_all, w_cls_ref[...], preferred_element_type=f32) + b_cls_ref[...]
    )


@functools.partial(jax.jit, static_argnames=("hidden_size",))
def action_intention_detection_forward(x_bbox, params, hidden_size):
    """x_bbox: (B, T, 4) float32. Returns (intent_detection_scores (B, T, 2), None)."""
    B, T, _ = x_bbox.shape
    # The reference initializes int_hx with torch.zeros(SEG_LEN, hidden_size); the GRU step
    # therefore requires batch == SEG_LEN. Enforce it instead of silently diverging.
    if B != T:
        raise ValueError(
            f"batch ({B}) must equal SEG_LEN ({T}) to match torch.zeros(SEG_LEN, hidden) init")
    H = hidden_size
    OUT_LANES = 128  # lane-dense output slab; first 2 lanes are the real scores

    # Time-major flatten: row index = t * B + b.
    x_tm = jnp.transpose(x_bbox, (1, 0, 2)).reshape(T * B, 4).astype(jnp.float32)
    x_aug = jnp.concatenate([x_tm, jnp.ones((T * B, 1), jnp.float32)], axis=-1)  # (T*B, 5)

    # bbox_embedding Linear(4, 272): pack weight^T and bias into one matrix.
    w_embb = jnp.concatenate(
        [params["w_emb"].T, params["b_emb"][None, :]], axis=0)                   # (5, 272)

    # GRUCell weights, split per gate (r, z, n) and pre-transposed.
    w_ih_g = params["w_ih"].reshape(3, H, 272).transpose(0, 2, 1)                # (3, 272, H)
    w_hh_g = params["w_hh"].reshape(3, H, H).transpose(0, 2, 1)                  # (3, H, H)

    b_ih = params["b_ih"].reshape(3, H)
    b_hh = params["b_hh"].reshape(3, H)
    # r/z gates: b_ih + b_hh folded into the time-independent gi precompute.
    # n gate: only b_ih folds into gi; b_hh_n stays inside r * (h @ W_hh_n + b_hh_n).
    b_pack = jnp.stack(
        [b_ih[0] + b_hh[0], b_ih[1] + b_hh[1], b_ih[2], b_hh[2]], axis=0)        # (4, H)

    # Intent classifier Linear(H, 2), zero-padded to 128 output lanes for an unmasked store.
    w_cls_pad = jnp.zeros((H, OUT_LANES), jnp.float32).at[:, :2].set(params["w_cls"].T)
    b_cls_pad = jnp.zeros((1, OUT_LANES), jnp.float32).at[:, :2].set(params["b_cls"])

    kernel = functools.partial(_intent_forward_kernel, seg_len=T, batch=B)
    vmem_specs = [pl.BlockSpec(memory_space=pltpu.MemorySpace.VMEM) for _ in range(7)]

    scores_pad = pl.pallas_call(
        kernel,
        out_shape=jax.ShapeDtypeStruct((T * B, OUT_LANES), jnp.float32),
        in_specs=vmem_specs,
        out_specs=pl.BlockSpec(memory_space=pltpu.MemorySpace.VMEM),
        scratch_shapes=[pltpu.VMEM((T * B, H), jnp.float32)],
    )(x_aug, w_embb, w_ih_g, w_hh_g, b_pack, w_cls_pad, b_cls_pad)

    scores = scores_pad[:, :2].reshape(T, B, 2)
    return jnp.transpose(scores, (1, 0, 2)), None


def _reference_forward(x_bbox, params, hidden_size):
    """Plain-JAX reference mirroring the PyTorch forward, for validation."""
    B, T, _ = x_bbox.shape
    h = jnp.zeros((B, hidden_size), jnp.float32)
    outs = []
    for t in range(T):
        emb = jnp.maximum(x_bbox[:, t] @ params["w_emb"].T + params["b_emb"], 0.0)
        gi = emb @ params["w_ih"].T + params["b_ih"]
        gh = h @ params["w_hh"].T + params["b_hh"]
        i_r, i_z, i_n = jnp.split(gi, 3, axis=-1)
        h_r, h_z, h_n = jnp.split(gh, 3, axis=-1)
        r = jax.nn.sigmoid(i_r + h_r)
        z = jax.nn.sigmoid(i_z + h_z)
        n = jnp.tanh(i_n + r * h_n)
        h = (1.0 - z) * n + z * h
        outs.append(h @ params["w_cls"].T + params["b_cls"])
    return jnp.stack(outs, axis=1)


def init_params(key, hidden_size):
    """Deterministic synthetic parameters matching the module's layer shapes."""
    ks = jax.random.split(key, 8)
    emb_dim = 272
    u = lambda k, shape, scale: jax.random.uniform(k, shape, jnp.float32, -scale, scale)
    return {
        "w_emb": u(ks[0], (emb_dim, 4), 0.5),                      # nn.Linear(4, 272)
        "b_emb": u(ks[1], (emb_dim,), 0.5),
        "w_ih": u(ks[2], (3 * hidden_size, emb_dim), 0.06),        # GRUCell(272, H)
        "b_ih": u(ks[3], (3 * hidden_size,), 0.06),
        "w_hh": u(ks[4], (3 * hidden_size, hidden_size), 0.18),
        "b_hh": u(ks[5], (3 * hidden_size,), 0.18),
        "w_cls": u(ks[6], (2, hidden_size), 0.18),                 # Linear(H, 2) intent score
        "b_cls": u(ks[7], (2,), 0.18),
    }


if __name__ == "__main__":
    SEG_LEN = 8
    BATCH = SEG_LEN  # reference inits int_hx with SEG_LEN rows -> batch must equal SEG_LEN
    HIDDEN = 32

    key = jax.random.PRNGKey(0)
    k_param, k_data = jax.random.split(key)
    params = init_params(k_param, HIDDEN)
    x_bbox = jax.random.uniform(k_data, (BATCH, SEG_LEN, 4), jnp.float32)

    scores, future = action_intention_detection_forward(x_bbox, params, HIDDEN)
    scores = jax.block_until_ready(scores)
    assert future is None
    assert scores.shape == (BATCH, SEG_LEN, 2)

    ref = _reference_forward(x_bbox, params, HIDDEN)
    assert jnp.allclose(scores, ref, atol=1e-5, rtol=1e-5), "mismatch vs plain-JAX reference"

    print("KERNEL_OK")
</pallas_src>

<mosaic_0001>
module attributes {stable_mosaic.version = 11 : i64} {
  func.func @_intent_forward_kernel(%arg0: memref<64x5xf32, #tpu.memory_space<vmem>>, %arg1: memref<5x272xf32, #tpu.memory_space<vmem>>, %arg2: memref<3x272x32xf32, #tpu.memory_space<vmem>>, %arg3: memref<3x32x32xf32, #tpu.memory_space<vmem>>, %arg4: memref<4x32xf32, #tpu.memory_space<vmem>>, %arg5: memref<32x128xf32, #tpu.memory_space<vmem>>, %arg6: memref<1x128xf32, #tpu.memory_space<vmem>>, %arg7: memref<64x128xf32, #tpu.memory_space<vmem>>, %arg8: memref<64x32xf32, #tpu.memory_space<vmem>>) attributes {dimension_semantics = [], scalar_prefetch = 0 : i64, scratch_operands = 1 : i64, tpu.core_type = #tpu.core_type<tc>} {
    %c0 = arith.constant 0 : index
    %c0_0 = arith.constant 0 : index
    %0 = vector.load %arg0[%c0, %c0_0] : memref<64x5xf32, #tpu.memory_space<vmem>>, vector<64x5xf32>
    %c0_1 = arith.constant 0 : index
    %c0_2 = arith.constant 0 : index
    %1 = vector.load %arg1[%c0_1, %c0_2] : memref<5x272xf32, #tpu.memory_space<vmem>>, vector<5x272xf32>
    %cst = arith.constant dense<0.000000e+00> : vector<64x272xf32>
    %2 = tpu.matmul %0, %1, %cst {dimension_numbers = #tpu.dot_dimension_numbers<[1], [0], [0], [1], [0, 0, 1, 1], [], []>} : vector<64x5xf32>, vector<5x272xf32>, vector<64x272xf32> -> vector<64x272xf32>
    %cst_3 = arith.constant 0.000000e+00 : f32
    %3 = vector.broadcast %cst_3 : f32 to vector<64x272xf32>
    %4 = arith.maximumf %2, %3 : vector<64x272xf32>
    %c0_4 = arith.constant 0 : index
    %c0_5 = arith.constant 0 : index
    %c0_6 = arith.constant 0 : index
    %5 = vector.load %arg2[%c0_4, %c0_5, %c0_6] : memref<3x272x32xf32, #tpu.memory_space<vmem>>, vector<1x272x32xf32>
    %6 = vector.shape_cast %5 : vector<1x272x32xf32> to vector<272x32xf32>
    %cst_7 = arith.constant dense<0.000000e+00> : vector<64x32xf32>
    %7 = tpu.matmul %4, %6, %cst_7 {dimension_numbers = #tpu.dot_dimension_numbers<[1], [0], [0], [1], [0, 0, 1, 1], [], []>} : vector<64x272xf32>, vector<272x32xf32>, vector<64x32xf32> -> vector<64x32xf32>
    %c0_8 = arith.constant 0 : index
    %c0_9 = arith.constant 0 : index
    %8 = vector.load %arg4[%c0_8, %c0_9] : memref<4x32xf32, #tpu.memory_space<vmem>>, vector<1x32xf32>
    %9 = vector.broadcast %8 : vector<1x32xf32> to vector<64x32xf32>
    %10 = arith.addf %7, %9 : vector<64x32xf32>
    %c1 = arith.constant 1 : index
    %c0_10 = arith.constant 0 : index
    %c0_11 = arith.constant 0 : index
    %11 = vector.load %arg2[%c1, %c0_10, %c0_11] : memref<3x272x32xf32, #tpu.memory_space<vmem>>, vector<1x272x32xf32>
    %12 = vector.shape_cast %11 : vector<1x272x32xf32> to vector<272x32xf32>
    %cst_12 = arith.constant dense<0.000000e+00> : vector<64x32xf32>
    %13 = tpu.matmul %4, %12, %cst_12 {dimension_numbers = #tpu.dot_dimension_numbers<[1], [0], [0], [1], [0, 0, 1, 1], [], []>} : vector<64x272xf32>, vector<272x32xf32>, vector<64x32xf32> -> vector<64x32xf32>
    %c1_13 = arith.constant 1 : index
    %c0_14 = arith.constant 0 : index
    %14 = vector.load %arg4[%c1_13, %c0_14] : memref<4x32xf32, #tpu.memory_space<vmem>>, vector<1x32xf32>
    %15 = vector.broadcast %14 : vector<1x32xf32> to vector<64x32xf32>
    %16 = arith.addf %13, %15 : vector<64x32xf32>
    %c2 = arith.constant 2 : index
    %c0_15 = arith.constant 0 : index
    %c0_16 = arith.constant 0 : index
    %17 = vector.load %arg2[%c2, %c0_15, %c0_16] : memref<3x272x32xf32, #tpu.memory_space<vmem>>, vector<1x272x32xf32>
    %18 = vector.shape_cast %17 : vector<1x272x32xf32> to vector<272x32xf32>
    %cst_17 = arith.constant dense<0.000000e+00> : vector<64x32xf32>
    %19 = tpu.matmul %4, %18, %cst_17 {dimension_numbers = #tpu.dot_dimension_numbers<[1], [0], [0], [1], [0, 0, 1, 1], [], []>} : vector<64x272xf32>, vector<272x32xf32>, vector<64x32xf32> -> vector<64x32xf32>
    %c2_18 = arith.constant 2 : index
    %c0_19 = arith.constant 0 : index
    %20 = vector.load %arg4[%c2_18, %c0_19] : memref<4x32xf32, #tpu.memory_space<vmem>>, vector<1x32xf32>
    %21 = vector.broadcast %20 : vector<1x32xf32> to vector<64x32xf32>
    %22 = arith.addf %19, %21 : vector<64x32xf32>
    %c3 = arith.constant 3 : index
    %c0_20 = arith.constant 0 : index
    %23 = vector.load %arg4[%c3, %c0_20] : memref<4x32xf32, #tpu.memory_space<vmem>>, vector<1x32xf32>
    %c0_21 = arith.constant 0 : index
    %c0_22 = arith.constant 0 : index
    %c0_23 = arith.constant 0 : index
    %24 = vector.load %arg3[%c0_21, %c0_22, %c0_23] : memref<3x32x32xf32, #tpu.memory_space<vmem>>, vector<1x32x32xf32>
    %25 = vector.shape_cast %24 : vector<1x32x32xf32> to vector<32x32xf32>
    %c1_24 = arith.constant 1 : index
    %c0_25 = arith.constant 0 : index
    %c0_26 = arith.constant 0 : index
    %26 = vector.load %arg3[%c1_24, %c0_25, %c0_26] : memref<3x32x32xf32, #tpu.memory_space<vmem>>, vector<1x32x32xf32>
    %27 = vector.shape_cast %26 : vector<1x32x32xf32> to vector<32x32xf32>
    %c2_27 = arith.constant 2 : index
    %c0_28 = arith.constant 0 : index
    %c0_29 = arith.constant 0 : index
    %28 = vector.load %arg3[%c2_27, %c0_28, %c0_29] : memref<3x32x32xf32, #tpu.memory_space<vmem>>, vector<1x32x32xf32>
    %29 = vector.shape_cast %28 : vector<1x32x32xf32> to vector<32x32xf32>
    %cst_30 = arith.constant 0.000000e+00 : f32
    %30 = vector.broadcast %cst_30 : f32 to vector<8x32xf32>
    %31 = vector.extract_strided_slice %10 {offsets = [0, 0], sizes = [8, 32], strides = [1, 1]} : vector<64x32xf32> to vector<8x32xf32>
    %cst_31 = arith.constant dense<0.000000e+00> : vector<8x32xf32>
    %32 = tpu.matmul %30, %25, %cst_31 {dimension_numbers = #tpu.dot_dimension_numbers<[1], [0], [0], [1], [0, 0, 1, 1], [], []>} : vector<8x32xf32>, vector<32x32xf32>, vector<8x32xf32> -> vector<8x32xf32>
    %33 = arith.addf %31, %32 : vector<8x32xf32>
    %34 = arith.negf %33 : vector<8x32xf32>
    %35 = math.exp %34 : vector<8x32xf32>
    %cst_32 = arith.constant 1.000000e+00 : f32
    %36 = vector.broadcast %cst_32 : f32 to vector<8x32xf32>
    %37 = arith.addf %36, %35 : vector<8x32xf32>
    %38 = arith.divf %36, %37 : vector<8x32xf32>
    %39 = vector.extract_strided_slice %16 {offsets = [0, 0], sizes = [8, 32], strides = [1, 1]} : vector<64x32xf32> to vector<8x32xf32>
    %cst_33 = arith.constant dense<0.000000e+00> : vector<8x32xf32>
    %40 = tpu.matmul %30, %27, %cst_33 {dimension_numbers = #tpu.dot_dimension_numbers<[1], [0], [0], [1], [0, 0, 1, 1], [], []>} : vector<8x32xf32>, vector<32x32xf32>, vector<8x32xf32> -> vector<8x32xf32>
    %41 = arith.addf %39, %40 : vector<8x32xf32>
    %42 = arith.negf %41 : vector<8x32xf32>
    %43 = math.exp %42 : vector<8x32xf32>
    %cst_34 = arith.constant 1.000000e+00 : f32
    %44 = vector.broadcast %cst_34 : f32 to vector<8x32xf32>
    %45 = arith.addf %44, %43 : vector<8x32xf32>
    %46 = arith.divf %44, %45 : vector<8x32xf32>
    %47 = vector.extract_strided_slice %22 {offsets = [0, 0], sizes = [8, 32], strides = [1, 1]} : vector<64x32xf32> to vector<8x32xf32>
    %cst_35 = arith.constant dense<0.000000e+00> : vector<8x32xf32>
    %48 = tpu.matmul %30, %29, %cst_35 {dimension_numbers = #tpu.dot_dimension_numbers<[1], [0], [0], [1], [0, 0, 1, 1], [], []>} : vector<8x32xf32>, vector<32x32xf32>, vector<8x32xf32> -> vector<8x32xf32>
    %49 = vector.broadcast %23 : vector<1x32xf32> to vector<8x32xf32>
    %50 = arith.addf %48, %49 : vector<8x32xf32>
    %51 = arith.mulf %38, %50 : vector<8x32xf32>
    %52 = arith.addf %47, %51 : vector<8x32xf32>
    %53 = math.tanh %52 : vector<8x32xf32>
    %cst_36 = arith.constant 1.000000e+00 : f32
    %54 = vector.broadcast %cst_36 : f32 to vector<8x32xf32>
    %55 = arith.subf %54, %46 : vector<8x32xf32>
    %56 = arith.mulf %55, %53 : vector<8x32xf32>
    %57 = arith.mulf %46, %30 : vector<8x32xf32>
    %58 = arith.addf %56, %57 : vector<8x32xf32>
    %c0_37 = arith.constant 0 : index
    %c0_38 = arith.constant 0 : index
    %59 = vector.load %arg8[%c0_37, %c0_38] : memref<64x32xf32, #tpu.memory_space<vmem>>, vector<8x32xf32>
    tpu.vector_store %arg8[%c0_37, %c0_38], %58 {strides = array<i32>} : memref<64x32xf32, #tpu.memory_space<vmem>>, vector<8x32xf32>,
    %60 = vector.extract_strided_slice %10 {offsets = [8, 0], sizes = [8, 32], strides = [1, 1]} : vector<64x32xf32> to vector<8x32xf32>
    %cst_39 = arith.constant dense<0.000000e+00> : vector<8x32xf32>
    %61 = tpu.matmul %58, %25, %cst_39 {dimension_numbers = #tpu.dot_dimension_numbers<[1], [0], [0], [1], [0, 0, 1, 1], [], []>} : vector<8x32xf32>, vector<32x32xf32>, vector<8x32xf32> -> vector<8x32xf32>
    %62 = arith.addf %60, %61 : vector<8x32xf32>
    %63 = arith.negf %62 : vector<8x32xf32>
    %64 = math.exp %63 : vector<8x32xf32>
    %cst_40 = arith.constant 1.000000e+00 : f32
    %65 = vector.broadcast %cst_40 : f32 to vector<8x32xf32>
    %66 = arith.addf %65, %64 : vector<8x32xf32>
    %67 = arith.divf %65, %66 : vector<8x32xf32>
    %68 = vector.extract_strided_slice %16 {offsets = [8, 0], sizes = [8, 32], strides = [1, 1]} : vector<64x32xf32> to vector<8x32xf32>
    %cst_41 = arith.constant dense<0.000000e+00> : vector<8x32xf32>
    %69 = tpu.matmul %58, %27, %cst_41 {dimension_numbers = #tpu.dot_dimension_numbers<[1], [0], [0], [1], [0, 0, 1, 1], [], []>} : vector<8x32xf32>, vector<32x32xf32>, vector<8x32xf32> -> vector<8x32xf32>
    %70 = arith.addf %68, %69 : vector<8x32xf32>
    %71 = arith.negf %70 : vector<8x32xf32>
    %72 = math.exp %71 : vector<8x32xf32>
    %cst_42 = arith.constant 1.000000e+00 : f32
    %73 = vector.broadcast %cst_42 : f32 to vector<8x32xf32>
    %74 = arith.addf %73, %72 : vector<8x32xf32>
    %75 = arith.divf %73, %74 : vector<8x32xf32>
    %76 = vector.extract_strided_slice %22 {offsets = [8, 0], sizes = [8, 32], strides = [1, 1]} : vector<64x32xf32> to vector<8x32xf32>
    %cst_43 = arith.constant dense<0.000000e+00> : vector<8x32xf32>
    %77 = tpu.matmul %58, %29, %cst_43 {dimension_numbers = #tpu.dot_dimension_numbers<[1], [0], [0], [1], [0, 0, 1, 1], [], []>} : vector<8x32xf32>, vector<32x32xf32>, vector<8x32xf32> -> vector<8x32xf32>
    %78 = vector.broadcast %23 : vector<1x32xf32> to vector<8x32xf32>
    %79 = arith.addf %77, %78 : vector<8x32xf32>
    %80 = arith.mulf %67, %79 : vector<8x32xf32>
    %81 = arith.addf %76, %80 : vector<8x32xf32>
    %82 = math.tanh %81 : vector<8x32xf32>
    %cst_44 = arith.constant 1.000000e+00 : f32
    %83 = vector.broadcast %cst_44 : f32 to vector<8x32xf32>
    %84 = arith.subf %83, %75 : vector<8x32xf32>
    %85 = arith.mulf %84, %82 : vector<8x32xf32>
    %86 = arith.mulf %75, %58 : vector<8x32xf32>
    %87 = arith.addf %85, %86 : vector<8x32xf32>
    %c8 = arith.constant 8 : index
    %c0_45 = arith.constant 0 : index
    %88 = vector.load %arg8[%c8, %c0_45] : memref<64x32xf32, #tpu.memory_space<vmem>>, vector<8x32xf32>
    tpu.vector_store %arg8[%c8, %c0_45], %87 {strides = array<i32>} : memref<64x32xf32, #tpu.memory_space<vmem>>, vector<8x32xf32>,
    %89 = vector.extract_strided_slice %10 {offsets = [16, 0], sizes = [8, 32], strides = [1, 1]} : vector<64x32xf32> to vector<8x32xf32>
    %cst_46 = arith.constant dense<0.000000e+00> : vector<8x32xf32>
    %90 = tpu.matmul %87, %25, %cst_46 {dimension_numbers = #tpu.dot_dimension_numbers<[1], [0], [0], [1], [0, 0, 1, 1], [], []>} : vector<8x32xf32>, vector<32x32xf32>, vector<8x32xf32> -> vector<8x32xf32>
    %91 = arith.addf %89, %90 : vector<8x32xf32>
    %92 = arith.negf %91 : vector<8x32xf32>
    %93 = math.exp %92 : vector<8x32xf32>
    %cst_47 = arith.constant 1.000000e+00 : f32
    %94 = vector.broadcast %cst_47 : f32 to vector<8x32xf32>
    %95 = arith.addf %94, %93 : vector<8x32xf32>
    %96 = arith.divf %94, %95 : vector<8x32xf32>
    %97 = vector.extract_strided_slice %16 {offsets = [16, 0], sizes = [8, 32], strides = [1, 1]} : vector<64x32xf32> to vector<8x32xf32>
    %cst_48 = arith.constant dense<0.000000e+00> : vector<8x32xf32>
    %98 = tpu.matmul %87, %27, %cst_48 {dimension_numbers = #tpu.dot_dimension_numbers<[1], [0], [0], [1], [0, 0, 1, 1], [], []>} : vector<8x32xf32>, vector<32x32xf32>, vector<8x32xf32> -> vector<8x32xf32>
    %99 = arith.addf %97, %98 : vector<8x32xf32>
    %100 = arith.negf %99 : vector<8x32xf32>
    %101 = math.exp %100 : vector<8x32xf32>
    %cst_49 = arith.constant 1.000000e+00 : f32
    %102 = vector.broadcast %cst_49 : f32 to vector<8x32xf32>
    %103 = arith.addf %102, %101 : vector<8x32xf32>
    %104 = arith.divf %102, %103 : vector<8x32xf32>
    %105 = vector.extract_strided_slice %22 {offsets = [16, 0], sizes = [8, 32], strides = [1, 1]} : vector<64x32xf32> to vector<8x32xf32>
    %cst_50 = arith.constant dense<0.000000e+00> : vector<8x32xf32>
    %106 = tpu.matmul %87, %29, %cst_50 {dimension_numbers = #tpu.dot_dimension_numbers<[1], [0], [0], [1], [0, 0, 1, 1], [], []>} : vector<8x32xf32>, vector<32x32xf32>, vector<8x32xf32> -> vector<8x32xf32>
    %107 = vector.broadcast %23 : vector<1x32xf32> to vector<8x32xf32>
    %108 = arith.addf %106, %107 : vector<8x32xf32>
    %109 = arith.mulf %96, %108 : vector<8x32xf32>
    %110 = arith.addf %105, %109 : vector<8x32xf32>
    %111 = math.tanh %110 : vector<8x32xf32>
    %cst_51 = arith.constant 1.000000e+00 : f32
    %112 = vector.broadcast %cst_51 : f32 to vector<8x32xf32>
    %113 = arith.subf %112, %104 : vector<8x32xf32>
    %114 = arith.mulf %113, %111 : vector<8x32xf32>
    %115 = arith.mulf %104, %87 : vector<8x32xf32>
    %116 = arith.addf %114, %115 : vector<8x32xf32>
    %c16 = arith.constant 16 : index
    %c0_52 = arith.constant 0 : index
    %117 = vector.load %arg8[%c16, %c0_52] : memref<64x32xf32, #tpu.memory_space<vmem>>, vector<8x32xf32>
    tpu.vector_store %arg8[%c16, %c0_52], %116 {strides = array<i32>} : memref<64x32xf32, #tpu.memory_space<vmem>>, vector<8x32xf32>,
    %118 = vector.extract_strided_slice %10 {offsets = [24, 0], sizes = [8, 32], strides = [1, 1]} : vector<64x32xf32> to vector<8x32xf32>
    %cst_53 = arith.constant dense<0.000000e+00> : vector<8x32xf32>
    %119 = tpu.matmul %116, %25, %cst_53 {dimension_numbers = #tpu.dot_dimension_numbers<[1], [0], [0], [1], [0, 0, 1, 1], [], []>} : vector<8x32xf32>, vector<32x32xf32>, vector<8x32xf32> -> vector<8x32xf32>
    %120 = arith.addf %118, %119 : vector<8x32xf32>
    %121 = arith.negf %120 : vector<8x32xf32>
    %122 = math.exp %121 : vector<8x32xf32>
    %cst_54 = arith.constant 1.000000e+00 : f32
    %123 = vector.broadcast %cst_54 : f32 to vector<8x32xf32>
    %124 = arith.addf %123, %122 : vector<8x32xf32>
    %125 = arith.divf %123, %124 : vector<8x32xf32>
    %126 = vector.extract_strided_slice %16 {offsets = [24, 0], sizes = [8, 32], strides = [1, 1]} : vector<64x32xf32> to vector<8x32xf32>
    %cst_55 = arith.constant dense<0.000000e+00> : vector<8x32xf32>
    %127 = tpu.matmul %116, %27, %cst_55 {dimension_numbers = #tpu.dot_dimension_numbers<[1], [0], [0], [1], [0, 0, 1, 1], [], []>} : vector<8x32xf32>, vector<32x32xf32>, vector<8x32xf32> -> vector<8x32xf32>
    %128 = arith.addf %126, %127 : vector<8x32xf32>
    %129 = arith.negf %128 : vector<8x32xf32>
    %130 = math.exp %129 : vector<8x32xf32>
    %cst_56 = arith.constant 1.000000e+00 : f32
    %131 = vector.broadcast %cst_56 : f32 to vector<8x32xf32>
    %132 = arith.addf %131, %130 : vector<8x32xf32>
    %133 = arith.divf %131, %132 : vector<8x32xf32>
    %134 = vector.extract_strided_slice %22 {offsets = [24, 0], sizes = [8, 32], strides = [1, 1]} : vector<64x32xf32> to vector<8x32xf32>
    %cst_57 = arith.constant dense<0.000000e+00> : vector<8x32xf32>
    %135 = tpu.matmul %116, %29, %cst_57 {dimension_numbers = #tpu.dot_dimension_numbers<[1], [0], [0], [1], [0, 0, 1, 1], [], []>} : vector<8x32xf32>, vector<32x32xf32>, vector<8x32xf32> -> vector<8x32xf32>
    %136 = vector.broadcast %23 : vector<1x32xf32> to vector<8x32xf32>
    %137 = arith.addf %135, %136 : vector<8x32xf32>
    %138 = arith.mulf %125, %137 : vector<8x32xf32>
    %139 = arith.addf %134, %138 : vector<8x32xf32>
    %140 = math.tanh %139 : vector<8x32xf32>
    %cst_58 = arith.constant 1.000000e+00 : f32
    %141 = vector.broadcast %cst_58 : f32 to vector<8x32xf32>
    %142 = arith.subf %141, %133 : vector<8x32xf32>
    %143 = arith.mulf %142, %140 : vector<8x32xf32>
    %144 = arith.mulf %133, %116 : vector<8x32xf32>
    %145 = arith.addf %143, %144 : vector<8x32xf32>
    %c24 = arith.constant 24 : index
    %c0_59 = arith.constant 0 : index
    %146 = vector.load %arg8[%c24, %c0_59] : memref<64x32xf32, #tpu.memory_space<vmem>>, vector<8x32xf32>
    tpu.vector_store %arg8[%c24, %c0_59], %145 {strides = array<i32>} : memref<64x32xf32, #tpu.memory_space<vmem>>, vector<8x32xf32>,
    %147 = vector.extract_strided_slice %10 {offsets = [32, 0], sizes = [8, 32], strides = [1, 1]} : vector<64x32xf32> to vector<8x32xf32>
    %cst_60 = arith.constant dense<0.000000e+00> : vector<8x32xf32>
    %148 = tpu.matmul %145, %25, %cst_60 {dimension_numbers = #tpu.dot_dimension_numbers<[1], [0], [0], [1], [0, 0, 1, 1], [], []>} : vector<8x32xf32>, vector<32x32xf32>, vector<8x32xf32> -> vector<8x32xf32>
    %149 = arith.addf %147, %148 : vector<8x32xf32>
    %150 = arith.negf %149 : vector<8x32xf32>
    %151 = math.exp %150 : vector<8x32xf32>
    %cst_61 = arith.constant 1.000000e+00 : f32
    %152 = vector.broadcast %cst_61 : f32 to vector<8x32xf32>
    %153 = arith.addf %152, %151 : vector<8x32xf32>
    %154 = arith.divf %152, %153 : vector<8x32xf32>
    %155 = vector.extract_strided_slice %16 {offsets = [32, 0], sizes = [8, 32], strides = [1, 1]} : vector<64x32xf32> to vector<8x32xf32>
    %cst_62 = arith.constant dense<0.000000e+00> : vector<8x32xf32>
    %156 = tpu.matmul %145, %27, %cst_62 {dimension_numbers = #tpu.dot_dimension_numbers<[1], [0], [0], [1], [0, 0, 1, 1], [], []>} : vector<8x32xf32>, vector<32x32xf32>, vector<8x32xf32> -> vector<8x32xf32>
    %157 = arith.addf %155, %156 : vector<8x32xf32>
    %158 = arith.negf %157 : vector<8x32xf32>
    %159 = math.exp %158 : vector<8x32xf32>
    %cst_63 = arith.constant 1.000000e+00 : f32
    %160 = vector.broadcast %cst_63 : f32 to vector<8x32xf32>
    %161 = arith.addf %160, %159 : vector<8x32xf32>
    %162 = arith.divf %160, %161 : vector<8x32xf32>
    %163 = vector.extract_strided_slice %22 {offsets = [32, 0], sizes = [8, 32], strides = [1, 1]} : vector<64x32xf32> to vector<8x32xf32>
    %cst_64 = arith.constant dense<0.000000e+00> : vector<8x32xf32>
    %164 = tpu.matmul %145, %29, %cst_64 {dimension_numbers = #tpu.dot_dimension_numbers<[1], [0], [0], [1], [0, 0, 1, 1], [], []>} : vector<8x32xf32>, vector<32x32xf32>, vector<8x32xf32> -> vector<8x32xf32>
    %165 = vector.broadcast %23 : vector<1x32xf32> to vector<8x32xf32>
    %166 = arith.addf %164, %165 : vector<8x32xf32>
    %167 = arith.mulf %154, %166 : vector<8x32xf32>
    %168 = arith.addf %163, %167 : vector<8x32xf32>
    %169 = math.tanh %168 : vector<8x32xf32>
    %cst_65 = arith.constant 1.000000e+00 : f32
    %170 = vector.broadcast %cst_65 : f32 to vector<8x32xf32>
    %171 = arith.subf %170, %162 : vector<8x32xf32>
    %172 = arith.mulf %171, %169 : vector<8x32xf32>
    %173 = arith.mulf %162, %145 : vector<8x32xf32>
    %174 = arith.addf %172, %173 : vector<8x32xf32>
    %c32 = arith.constant 32 : index
    %c0_66 = arith.constant 0 : index
    %175 = vector.load %arg8[%c32, %c0_66] : memref<64x32xf32, #tpu.memory_space<vmem>>, vector<8x32xf32>
    tpu.vector_store %arg8[%c32, %c0_66], %174 {strides = array<i32>} : memref<64x32xf32, #tpu.memory_space<vmem>>, vector<8x32xf32>,
    %176 = vector.extract_strided_slice %10 {offsets = [40, 0], sizes = [8, 32], strides = [1, 1]} : vector<64x32xf32> to vector<8x32xf32>
    %cst_67 = arith.constant dense<0.000000e+00> : vector<8x32xf32>
    %177 = tpu.matmul %174, %25, %cst_67 {dimension_numbers = #tpu.dot_dimension_numbers<[1], [0], [0], [1], [0, 0, 1, 1], [], []>} : vector<8x32xf32>, vector<32x32xf32>, vector<8x32xf32> -> vector<8x32xf32>
    %178 = arith.addf %176, %177 : vector<8x32xf32>
    %179 = arith.negf %178 : vector<8x32xf32>
    %180 = math.exp %179 : vector<8x32xf32>
    %cst_68 = arith.constant 1.000000e+00 : f32
    %181 = vector.broadcast %cst_68 : f32 to vector<8x32xf32>
    %182 = arith.addf %181, %180 : vector<8x32xf32>
    %183 = arith.divf %181, %182 : vector<8x32xf32>
    %184 = vector.extract_strided_slice %16 {offsets = [40, 0], sizes = [8, 32], strides = [1, 1]} : vector<64x32xf32> to vector<8x32xf32>
    %cst_69 = arith.constant dense<0.000000e+00> : vector<8x32xf32>
    %185 = tpu.matmul %174, %27, %cst_69 {dimension_numbers = #tpu.dot_dimension_numbers<[1], [0], [0], [1], [0, 0, 1, 1], [], []>} : vector<8x32xf32>, vector<32x32xf32>, vector<8x32xf32> -> vector<8x32xf32>
    %186 = arith.addf %184, %185 : vector<8x32xf32>
    %187 = arith.negf %186 : vector<8x32xf32>
    %188 = math.exp %187 : vector<8x32xf32>
    %cst_70 = arith.constant 1.000000e+00 : f32
    %189 = vector.broadcast %cst_70 : f32 to vector<8x32xf32>
    %190 = arith.addf %189, %188 : vector<8x32xf32>
    %191 = arith.divf %189, %190 : vector<8x32xf32>
    %192 = vector.extract_strided_slice %22 {offsets = [40, 0], sizes = [8, 32], strides = [1, 1]} : vector<64x32xf32> to vector<8x32xf32>
    %cst_71 = arith.constant dense<0.000000e+00> : vector<8x32xf32>
    %193 = tpu.matmul %174, %29, %cst_71 {dimension_numbers = #tpu.dot_dimension_numbers<[1], [0], [0], [1], [0, 0, 1, 1], [], []>} : vector<8x32xf32>, vector<32x32xf32>, vector<8x32xf32> -> vector<8x32xf32>
    %194 = vector.broadcast %23 : vector<1x32xf32> to vector<8x32xf32>
    %195 = arith.addf %193, %194 : vector<8x32xf32>
    %196 = arith.mulf %183, %195 : vector<8x32xf32>
    %197 = arith.addf %192, %196 : vector<8x32xf32>
    %198 = math.tanh %197 : vector<8x32xf32>
    %cst_72 = arith.constant 1.000000e+00 : f32
    %199 = vector.broadcast %cst_72 : f32 to vector<8x32xf32>
    %200 = arith.subf %199, %191 : vector<8x32xf32>
    %201 = arith.mulf %200, %198 : vector<8x32xf32>
    %202 = arith.mulf %191, %174 : vector<8x32xf32>
    %203 = arith.addf %201, %202 : vector<8x32xf32>
    %c40 = arith.constant 40 : index
    %c0_73 = arith.constant 0 : index
    %204 = vector.load %arg8[%c40, %c0_73] : memref<64x32xf32, #tpu.memory_space<vmem>>, vector<8x32xf32>
    tpu.vector_store %arg8[%c40, %c0_73], %203 {strides = array<i32>} : memref<64x32xf32, #tpu.memory_space<vmem>>, vector<8x32xf32>,
    %205 = vector.extract_strided_slice %10 {offsets = [48, 0], sizes = [8, 32], strides = [1, 1]} : vector<64x32xf32> to vector<8x32xf32>
    %cst_74 = arith.constant dense<0.000000e+00> : vector<8x32xf32>
    %206 = tpu.matmul %203, %25, %cst_74 {dimension_numbers = #tpu.dot_dimension_numbers<[1], [0], [0], [1], [0, 0, 1, 1], [], []>} : vector<8x32xf32>, vector<32x32xf32>, vector<8x32xf32> -> vector<8x32xf32>
    %207 = arith.addf %205, %206 : vector<8x32xf32>
    %208 = arith.negf %207 : vector<8x32xf32>
    %209 = math.exp %208 : vector<8x32xf32>
    %cst_75 = arith.constant 1.000000e+00 : f32
    %210 = vector.broadcast %cst_75 : f32 to vector<8x32xf32>
    %211 = arith.addf %210, %209 : vector<8x32xf32>
    %212 = arith.divf %210, %211 : vector<8x32xf32>
    %213 = vector.extract_strided_slice %16 {offsets = [48, 0], sizes = [8, 32], strides = [1, 1]} : vector<64x32xf32> to vector<8x32xf32>
    %cst_76 = arith.constant dense<0.000000e+00> : vector<8x32xf32>
    %214 = tpu.matmul %203, %27, %cst_76 {dimension_numbers = #tpu.dot_dimension_numbers<[1], [0], [0], [1], [0, 0, 1, 1], [], []>} : vector<8x32xf32>, vector<32x32xf32>, vector<8x32xf32> -> vector<8x32xf32>
    %215 = arith.addf %213, %214 : vector<8x32xf32>
    %216 = arith.negf %215 : vector<8x32xf32>
    %217 = math.exp %216 : vector<8x32xf32>
    %cst_77 = arith.constant 1.000000e+00 : f32
    %218 = vector.broadcast %cst_77 : f32 to vector<8x32xf32>
    %219 = arith.addf %218, %217 : vector<8x32xf32>
    %220 = arith.divf %218, %219 : vector<8x32xf32>
    %221 = vector.extract_strided_slice %22 {offsets = [48, 0], sizes = [8, 32], strides = [1, 1]} : vector<64x32xf32> to vector<8x32xf32>
    %cst_78 = arith.constant dense<0.000000e+00> : vector<8x32xf32>
    %222 = tpu.matmul %203, %29, %cst_78 {dimension_numbers = #tpu.dot_dimension_numbers<[1], [0], [0], [1], [0, 0, 1, 1], [], []>} : vector<8x32xf32>, vector<32x32xf32>, vector<8x32xf32> -> vector<8x32xf32>
    %223 = vector.broadcast %23 : vector<1x32xf32> to vector<8x32xf32>
    %224 = arith.addf %222, %223 : vector<8x32xf32>
    %225 = arith.mulf %212, %224 : vector<8x32xf32>
    %226 = arith.addf %221, %225 : vector<8x32xf32>
    %227 = math.tanh %226 : vector<8x32xf32>
    %cst_79 = arith.constant 1.000000e+00 : f32
    %228 = vector.broadcast %cst_79 : f32 to vector<8x32xf32>
    %229 = arith.subf %228, %220 : vector<8x32xf32>
    %230 = arith.mulf %229, %227 : vector<8x32xf32>
    %231 = arith.mulf %220, %203 : vector<8x32xf32>
    %232 = arith.addf %230, %231 : vector<8x32xf32>
    %c48 = arith.constant 48 : index
    %c0_80 = arith.constant 0 : index
    %233 = vector.load %arg8[%c48, %c0_80] : memref<64x32xf32, #tpu.memory_space<vmem>>, vector<8x32xf32>
    tpu.vector_store %arg8[%c48, %c0_80], %232 {strides = array<i32>} : memref<64x32xf32, #tpu.memory_space<vmem>>, vector<8x32xf32>,
    %234 = vector.extract_strided_slice %10 {offsets = [56, 0], sizes = [8, 32], strides = [1, 1]} : vector<64x32xf32> to vector<8x32xf32>
    %cst_81 = arith.constant dense<0.000000e+00> : vector<8x32xf32>
    %235 = tpu.matmul %232, %25, %cst_81 {dimension_numbers = #tpu.dot_dimension_numbers<[1], [0], [0], [1], [0, 0, 1, 1], [], []>} : vector<8x32xf32>, vector<32x32xf32>, vector<8x32xf32> -> vector<8x32xf32>
    %236 = arith.addf %234, %235 : vector<8x32xf32>
    %237 = arith.negf %236 : vector<8x32xf32>
    %238 = math.exp %237 : vector<8x32xf32>
    %cst_82 = arith.constant 1.000000e+00 : f32
    %239 = vector.broadcast %cst_82 : f32 to vector<8x32xf32>
    %240 = arith.addf %239, %238 : vector<8x32xf32>
    %241 = arith.divf %239, %240 : vector<8x32xf32>
    %242 = vector.extract_strided_slice %16 {offsets = [56, 0], sizes = [8, 32], strides = [1, 1]} : vector<64x32xf32> to vector<8x32xf32>
    %cst_83 = arith.constant dense<0.000000e+00> : vector<8x32xf32>
    %243 = tpu.matmul %232, %27, %cst_83 {dimension_numbers = #tpu.dot_dimension_numbers<[1], [0], [0], [1], [0, 0, 1, 1], [], []>} : vector<8x32xf32>, vector<32x32xf32>, vector<8x32xf32> -> vector<8x32xf32>
    %244 = arith.addf %242, %243 : vector<8x32xf32>
    %245 = arith.negf %244 : vector<8x32xf32>
    %246 = math.exp %245 : vector<8x32xf32>
    %cst_84 = arith.constant 1.000000e+00 : f32
    %247 = vector.broadcast %cst_84 : f32 to vector<8x32xf32>
    %248 = arith.addf %247, %246 : vector<8x32xf32>
    %249 = arith.divf %247, %248 : vector<8x32xf32>
    %250 = vector.extract_strided_slice %22 {offsets = [56, 0], sizes = [8, 32], strides = [1, 1]} : vector<64x32xf32> to vector<8x32xf32>
    %cst_85 = arith.constant dense<0.000000e+00> : vector<8x32xf32>
    %251 = tpu.matmul %232, %29, %cst_85 {dimension_numbers = #tpu.dot_dimension_numbers<[1], [0], [0], [1], [0, 0, 1, 1], [], []>} : vector<8x32xf32>, vector<32x32xf32>, vector<8x32xf32> -> vector<8x32xf32>
    %252 = vector.broadcast %23 : vector<1x32xf32> to vector<8x32xf32>
    %253 = arith.addf %251, %252 : vector<8x32xf32>
    %254 = arith.mulf %241, %253 : vector<8x32xf32>
    %255 = arith.addf %250, %254 : vector<8x32xf32>
    %256 = math.tanh %255 : vector<8x32xf32>
    %cst_86 = arith.constant 1.000000e+00 : f32
    %257 = vector.broadcast %cst_86 : f32 to vector<8x32xf32>
    %258 = arith.subf %257, %249 : vector<8x32xf32>
    %259 = arith.mulf %258, %256 : vector<8x32xf32>
    %260 = arith.mulf %249, %232 : vector<8x32xf32>
    %261 = arith.addf %259, %260 : vector<8x32xf32>
    %c56 = arith.constant 56 : index
    %c0_87 = arith.constant 0 : index
    %262 = vector.load %arg8[%c56, %c0_87] : memref<64x32xf32, #tpu.memory_space<vmem>>, vector<8x32xf32>
    tpu.vector_store %arg8[%c56, %c0_87], %261 {strides = array<i32>} : memref<64x32xf32, #tpu.memory_space<vmem>>, vector<8x32xf32>,
    %c0_88 = arith.constant 0 : index
    %c0_89 = arith.constant 0 : index
    %263 = vector.load %arg8[%c0_88, %c0_89] : memref<64x32xf32, #tpu.memory_space<vmem>>, vector<64x32xf32>
    %c0_90 = arith.constant 0 : index
    %c0_91 = arith.constant 0 : index
    %264 = vector.load %arg5[%c0_90, %c0_91] : memref<32x128xf32, #tpu.memory_space<vmem>>, vector<32x128xf32>
    %cst_92 = arith.constant dense<0.000000e+00> : vector<64x128xf32>
    %265 = tpu.matmul %263, %264, %cst_92 {dimension_numbers = #tpu.dot_dimension_numbers<[1], [0], [0], [1], [0, 0, 1, 1], [], []>} : vector<64x32xf32>, vector<32x128xf32>, vector<64x128xf32> -> vector<64x128xf32>
    %c0_93 = arith.constant 0 : index
    %c0_94 = arith.constant 0 : index
    %266 = vector.load %arg6[%c0_93, %c0_94] : memref<1x128xf32, #tpu.memory_space<vmem>>, vector<1x128xf32>
    %267 = vector.broadcast %266 : vector<1x128xf32> to vector<64x128xf32>
    %268 = arith.addf %265, %267 : vector<64x128xf32>
    %c0_95 = arith.constant 0 : index
    %c0_96 = arith.constant 0 : index
    %269 = vector.load %arg7[%c0_95, %c0_96] : memref<64x128xf32, #tpu.memory_space<vmem>>, vector<64x128xf32>
    tpu.vector_store %arg7[%c0_95, %c0_96], %268 {strides = array<i32>} : memref<64x128xf32, #tpu.memory_space<vmem>>, vector<64x128xf32>,
    return
  }
}

</mosaic_0001>

<bundles_post_ra>
// kernel: action_intention_detection_forward.1
= control target key start
LH: loop header
LB: loop body
LE: loop exit
PB: predicated region body
PF: predicated region fallthrough
CT: control target
= control target key end

     0   :  { %vm62_vm0 = vcmask 1044480   ;;  %vm37_vm1 = vcmask 39936   ;;  %v4347_v3 = vmov 0.0   ;;  %vm353_vm2 = vcmask 130048   ;;  %s5269_s1 = inlined_call_operand.vmem [shape: f32[5,272], index: 1, kind: input, shape index: {}]   ;;  %s5270_s0 = inlined_call_operand.vmem [shape: f32[64,5], index: 0, kind: input, shape index: {}]   ;;  %s5271_s2 = inlined_call_operand.vmem [shape: f32[3,272,32], index: 2, kind: input, shape index: {}]   ;;  %s5272_s3 = inlined_call_operand.vmem [shape: f32[3,32,32], index: 3, kind: input, shape index: {}]   ;;  %s5273_s4 = inlined_call_operand.vmem [shape: f32[4,32], index: 4, kind: input, shape index: {}]   ;;  %s5274_s5 = inlined_call_operand.vmem [shape: f32[32,128], index: 5, kind: input, shape index: {}]   ;;  %s5275_s6 = inlined_call_operand.vmem [shape: f32[1,128], index: 6, kind: input, shape index: {}]   ;;  %s5276_s7 = inlined_call_operand.vmem [shape: f32[64,128], index: 7, kind: output, shape index: {}]  }
   0x1   :  { %v35_v0 = vld [vmem:[%s5269_s1 + $0x8] sm:$0x1f]  ;;  %v36_v1 = vld [vmem:[%s5269_s1 + $0x10] sm:$0x1f]  ;;  %v34_v2 = vld [vmem:[%s5269_s1] sm:$0x1f]  ;;  %136 = vmatprep.mubr.f32.mxu0 %v4347_v3 }
   0x2   :  { %3148 = vmatprep.subr.msk.mxu0 %vm62_vm0, %v35_v0  ;;  %3656 = vmatprep.subr.msk.mxu1 %vm62_vm0, %v36_v1  ;;  %v26_v4 = vld [vmem:[%s5270_s0] sm:$0xff]  ;;  %v27_v5 = vld [vmem:[%s5270_s0 + $0x8] sm:$0xff]  ;;  %v28_v6 = vld [vmem:[%s5270_s0 + $0x10] sm:$0xff]  ;;  %vm4349_vm3 = vmmov 0   ;;  %vm1103_vm4 = vcmask 261120  }
   0x3   :  { %3149 = vmatpush1.msk.msra.mxu0 %vm62_vm0, %v34_v2  ;;  %3657 = vmatpush3.msk.msra.mxu1 %vm62_vm0, %v36_v1  ;;  %v330_v7 = vld [vmem:[%s5271_s2 + $0x80] sm:$0xff]  ;;  %v331_v8 = vld [vmem:[%s5271_s2 + $0x88] sm:$0xff]  ;;  %v29_v11 = vld [vmem:[%s5270_s0 + $0x18] sm:$0xff] }
   0x4   :  { %3658 = vmatprep.mubr.msk.f32.mxu1 %vm37_vm1, %v26_v4  ;;  %3150 = vmatmul.mubr.msk.f32.vlgmr.msra.gmra.mrb[0].mxu0 %vm37_vm1, %v26_v4  ;;  %v314_v9 = vld [vmem:[%s5271_s2] sm:$0xff]  ;;  %v315_v10 = vld [vmem:[%s5271_s2 + $0x8] sm:$0xff]  ;;  %v4002_v12 = vpack.c.bf16 %v331_v8, %v330_v7  ;;  %v332_v14 = vld [vmem:[%s5271_s2 + $0x90] sm:$0xff] }
   0x5   :  { %3659 = vmatmul.mubr.msk.f32.vlgmr.msra.gmra.mrb[0].mxu1 %vm37_vm1, %v27_v5  ;;  %142 = vmatprep.mubr.f32.mxu0 %v4347_v3  ;;  %v4004_v13 = vpack.c.bf16 %v315_v10, %v314_v9  ;;  %v333_v15 = vld [vmem:[%s5271_s2 + $0x98] sm:$0xff]  ;;  %v30_v16 = vld [vmem:[%s5270_s0 + $0x20] sm:$0xff]  ;;  %v316_v18 = vld [vmem:[%s5271_s2 + $0x10] sm:$0xff] }
   0x6   :  { %3661 = vmatprep.mubr.msk.f32.mxu1 %vm37_vm1, %v28_v6  ;;  %v4006_v17 = vpack.c.bf16 %v333_v15, %v332_v14  ;;  %v317_v19 = vld [vmem:[%s5271_s2 + $0x18] sm:$0xff]  ;;  %4003 = vmatprep.subr.bf16.mxu0 %v4002_v12  ;;  %v334_v20 = vld [vmem:[%s5271_s2 + $0xa0] sm:$0xff]  ;;  %v335_v21 = vld [vmem:[%s5271_s2 + $0xa8] sm:$0xff] }
   0x7   :  { %v31_v22 = vld [vmem:[%s5270_s0 + $0x28] sm:$0xff]  ;;  %4005 = vmatpush3.bf16.msra.mxu0 %v4004_v13  ;;  %v4008_v23 = vpack.c.bf16 %v317_v19, %v316_v18  ;;  %v32_v24 = vld [vmem:[%s5270_s0 + $0x30] sm:$0xff]  ;;  %v4010_v25 = vpack.c.bf16 %v335_v21, %v334_v20  ;;  %v318_v26 = vld [vmem:[%s5271_s2 + $0x20] sm:$0xff] }
   0x8   :  { %3151 = vmatmul.mubr.msk.f32.gmra.mrb[2].mxu0 %vm37_vm1, %v27_v5  ;;  %4007 = vmatprep.subr.bf16.mxu0 %v4006_v17  ;;  %v319_v27 = vld [vmem:[%s5271_s2 + $0x28] sm:$0xff]  ;;  %v336_v28 = vld [vmem:[%s5271_s2 + $0xb0] sm:$0xff]  ;;  %v337_v29 = vld [vmem:[%s5271_s2 + $0xb8] sm:$0xff] }
   0x9   :  { %3662 = vmatmul.mubr.msk.f32.gmra.mrb[2].mxu1 %vm37_vm1, %v29_v11  ;;  %148 = vmatprep.mubr.f32.mxu0 %v4347_v3  ;;  %v33_v30 = vld [vmem:[%s5270_s0 + $0x38] sm:$0xff]  ;;  %v4012_v31 = vpack.c.bf16 %v319_v27, %v318_v26  ;;  %v4014_v32 = vpack.c.bf16 %v337_v29, %v336_v28  ;;  %v320_v33 = vld [vmem:[%s5271_s2 + $0x30] sm:$0xff]  ;;  %v338_v35 = vld [vmem:[%s5271_s2 + $0xc0] sm:$0xff] }
   0xa   :  { %3664 = vmatprep.mubr.msk.f32.mxu1 %vm37_vm1, %v30_v16  ;;  %v321_v34 = vld [vmem:[%s5271_s2 + $0x38] sm:$0xff]  ;;  %v339_v36 = vld [vmem:[%s5271_s2 + $0xc8] sm:$0xff]  ;;  %v322_v39 = vld [vmem:[%s5271_s2 + $0x40] sm:$0xff] }
   0xb   :  { %4009 = vmatpush3.bf16.msra.mxu0 %v4008_v23  ;;  %v4016_v37 = vpack.c.bf16 %v321_v34, %v320_v33  ;;  %v4018_v38 = vpack.c.bf16 %v339_v36, %v338_v35  ;;  %v323_v40 = vld [vmem:[%s5271_s2 + $0x48] sm:$0xff]  ;;  %v340_v41 = vld [vmem:[%s5271_s2 + $0xd0] sm:$0xff]  ;;  %v341_v42 = vld [vmem:[%s5271_s2 + $0xd8] sm:$0xff] }
   0xc   :  { %3152 = vmatmul.mubr.msk.f32.gmra.mrb[4].mxu0 %vm37_vm1, %v28_v6  ;;  %4011 = vmatprep.subr.bf16.mxu0 %v4010_v25  ;;  %v4020_v43 = vpack.c.bf16 %v323_v40, %v322_v39  ;;  %v4022_v44 = vpack.c.bf16 %v341_v42, %v340_v41  ;;  %v324_v45 = vld [vmem:[%s5271_s2 + $0x50] sm:$0xff]  ;;  %v325_v46 = vld [vmem:[%s5271_s2 + $0x58] sm:$0xff]  ;;  %v342_v47 = vld [vmem:[%s5271_s2 + $0xe0] sm:$0xff] }
   0xd   :  { %3665 = vmatmul.mubr.msk.f32.gmra.mrb[4].mxu1 %vm37_vm1, %v31_v22  ;;  %154 = vmatprep.mubr.f32.mxu0 %v4347_v3  ;;  %v343_v48 = vld [vmem:[%s5271_s2 + $0xe8] sm:$0xff]  ;;  %v4024_v49 = vpack.c.bf16 %v325_v46, %v324_v45  ;;  %v326_v51 = vld [vmem:[%s5271_s2 + $0x60] sm:$0xff]  ;;  %v344_v56 = vld [vmem:[%s5271_s2 + $0xf0] sm:$0xff] }
   0xe   :  { %3667 = vmatprep.mubr.msk.f32.mxu1 %vm37_vm1, %v32_v24  ;;  %v4026_v50 = vpack.c.bf16 %v343_v48, %v342_v47  ;;  %v327_v52 = vld [vmem:[%s5271_s2 + $0x68] sm:$0xff]  ;;  %v346_v54 = vld [vmem:[%s5271_s2 + $0x100] sm:$0xff]  ;;  %v345_v57 = vld [vmem:[%s5271_s2 + $0xf8] sm:$0xff] }
   0xf   :  { %4013 = vmatpush3.bf16.msra.mxu0 %v4012_v31  ;;  %v4028_v53 = vpack.c.bf16 %v327_v52, %v326_v51  ;;  %v347_v55 = vld [vmem:[%s5271_s2 + $0x108] sm:$0xff]  ;;  %v4030_v59 = vpack.c.bf16 %v345_v57, %v344_v56  ;;  %v328_v60 = vld [vmem:[%s5271_s2 + $0x70] sm:$0xff]  ;;  %v329_v61 = vld [vmem:[%s5271_s2 + $0x78] sm:$0xff] }
  0x10   :  { %3153 = vmatmul.mubr.msk.f32.gmra.mrb[6].mxu0 %vm37_vm1, %v29_v11  ;;  %4015 = vmatprep.subr.bf16.mxu0 %v4014_v32  ;;  %v4034_v58 = vpack.c.bf16 %v347_v55, %v346_v54  ;;  %v4032_v62 = vpack.c.bf16 %v329_v61, %v328_v60  ;;  %v3192_v63 = vld [vmem:[%s5271_s2 + $0x190] sm:$0xff]  ;;  %v3193_v0 = vld [vmem:[%s5271_s2 + $0x198] sm:$0xff]  ;;  %v3251_v9 = vld [vmem:[%s5271_s2 + $0x320] sm:$0xff] }
  0x11   :  { %3668 = vmatmul.mubr.msk.f32.gmra.mrb[6].mxu1 %vm37_vm1, %v33_v30  ;;  %160 = vmatprep.mubr.f32.mxu0 %v4347_v3  ;;  %v4038_v1 = vpack.c.bf16 %v3193_v0, %v3192_v63  ;;  %v3208_v2 = vld [vmem:[%s5271_s2 + $0x210] sm:$0xff]  ;;  %v3209_v4 = vld [vmem:[%s5271_s2 + $0x218] sm:$0xff]  ;;  %v3252_v10 = vld [vmem:[%s5271_s2 + $0x328] sm:$0xff] }
  0x12   :  { %4035 = vmatprep.subr.bf16.mxu1 %v4034_v58  ;;  %v4070_v5 = vpack.c.bf16 %v3209_v4, %v3208_v2  ;;  %v3176_v6 = vld [vmem:[%s5271_s2 + $0x110] sm:$0xff]  ;;  %v3177_v8 = vld [vmem:[%s5271_s2 + $0x118] sm:$0xff]  ;;  %v3194_v13 = vld [vmem:[%s5271_s2 + $0x1a0] sm:$0xff]  ;;  %v4587_v21 = vpack.c.bf16 %v3252_v10, %v3251_v9 }
  0x13   :  { %4017 = vmatpush3.bf16.msra.mxu0 %v4016_v37  ;;  %4037 = vmatpush3.bf16.msra.mxu1 %v4034_v58  ;;  %v3195_v14 = vld [vmem:[%s5271_s2 + $0x1a8] sm:$0xff]  ;;  %v4040_v20 = vpack.c.bf16 %v3177_v8, %v3176_v6  ;;  %v3196_v28 = vld [vmem:[%s5271_s2 + $0x1b0] sm:$0xff]  ;;  %v3197_v29 = vld [vmem:[%s5271_s2 + $0x1b8] sm:$0xff] }
  0x14   :  { %3154 = vmatmul.mubr.msk.f32.gmra.mrb[8].mxu0 %vm37_vm1, %v30_v16  ;;  %4019 = vmatprep.subr.bf16.mxu0 %v4018_v38  ;;  %v4042_v23 = vpack.c.bf16 %v3195_v14, %v3194_v13  ;;  %v3179_v25 = vld [vmem:[%s5271_s2 + $0x128] sm:$0xff]  ;;  %v4046_v37 = vpack.c.bf16 %v3197_v29, %v3196_v28  ;;  %v3180_v38 = vld [vmem:[%s5271_s2 + $0x130] sm:$0xff]  ;;  %v3181_v39 = vld [vmem:[%s5271_s2 + $0x138] sm:$0xff] }
  0x15   :  { %166 = vmatprep.mubr.f32.mxu0 %v4347_v3  ;;  %4039 = vmatprep.subr.bf16.mxu1 %v4038_v1  ;;  %v3198_v42 = vld [vmem:[%s5271_s2 + $0x1c0] sm:$0xff]  ;;  %v3200_v56 = vld [vmem:[%s5271_s2 + $0x1d0] sm:$0xff]  ;;  %v3201_v57 = vld [vmem:[%s5271_s2 + $0x1d8] sm:$0xff] }
  0x16   :  { %v3182_v52 = vld [vmem:[%s5271_s2 + $0x140] sm:$0xff]  ;;  %v4054_v1 = vpack.c.bf16 %v3201_v57, %v3200_v56  ;;  %v3184_v2 = vld [vmem:[%s5271_s2 + $0x150] sm:$0xff]  ;;  %v3185_v4 = vld [vmem:[%s5271_s2 + $0x158] sm:$0xff] }
  0x17   :  { %4021 = vmatpush3.bf16.msra.mxu0 %v4020_v43  ;;  %v3199_v43 = vld [vmem:[%s5271_s2 + $0x1c8] sm:$0xff]  ;;  %v3202_v6 = vld [vmem:[%s5271_s2 + $0x1e0] sm:$0xff]  ;;  %v4056_v10 = vpack.c.bf16 %v3185_v4, %v3184_v2  ;;  %v3188_v28 = vld [vmem:[%s5271_s2 + $0x170] sm:$0xff] }
  0x18   :  { %3155 = vmatmul.mubr.msk.f32.gmra.mrb[10].mxu0 %vm37_vm1, %v31_v22  ;;  %4023 = vmatprep.subr.bf16.mxu0 %v4022_v44  ;;  %v4050_v51 = vpack.c.bf16 %v3199_v43, %v3198_v42  ;;  %v3186_v13 = vld [vmem:[%s5271_s2 + $0x160] sm:$0xff]  ;;  %v3187_v14 = vld [vmem:[%s5271_s2 + $0x168] sm:$0xff]  ;;  %v3189_v29 = vld [vmem:[%s5271_s2 + $0x178] sm:$0xff] }
  0x19   :  { %172 = vmatprep.mubr.f32.mxu0 %v4347_v3  ;;  %v3190_v42 = vld [vmem:[%s5271_s2 + $0x180] sm:$0xff]  ;;  %v3191_v43 = vld [vmem:[%s5271_s2 + $0x188] sm:$0xff]  ;;  %v3237_v57 = vld [vmem:[%s5271_s2 + $0x2b0] sm:$0xff] }
  0x1a   :  { %v3220_v56 = vld [vmem:[%s5271_s2 + $0x228] sm:$0xff]  ;;  %v3222_v2 = vld [vmem:[%s5271_s2 + $0x238] sm:$0xff]  ;;  %v3239_v4 = vld [vmem:[%s5271_s2 + $0x2c0] sm:$0xff] }
  0x1b   :  { %4025 = vmatpush3.bf16.msra.mxu0 %v4024_v49  ;;  %v4048_v49 = vpack.c.bf16 %v3181_v39, %v3180_v38  ;;  %v4064_v39 = vpack.c.bf16 %v3189_v29, %v3188_v28  ;;  %v1089_v29 = vld [vmem:[%s5272_s3] sm:$0xff] }
  0x1c   :  { %3156 = vmatmul.mubr.msk.f32.gmra.mrb[12].mxu0 %vm37_vm1, %v32_v24  ;;  %4027 = vmatprep.subr.bf16.mxu0 %v4026_v50  ;;  %v3178_v24 = vld [vmem:[%s5271_s2 + $0x120] sm:$0xff] }
  0x1d   :  { %178 = vmatprep.mubr.f32.mxu0 %v4347_v3  ;;  %v4044_v35 = vpack.c.bf16 %v3179_v25, %v3178_v24  ;;  %v4060_v25 = vpack.c.bf16 %v3187_v14, %v3186_v13  ;;  %v3242_v13 = vld [vmem:[%s5271_s2 + $0x2d8] sm:$0xff]  ;;  %v4348_v14 = vmov 0.0|0.0  }
  0x1f   :  { %4029 = vmatpush3.bf16.msra.mxu0 %v4028_v53  ;;  %v3183_v53 = vld [vmem:[%s5271_s2 + $0x148] sm:$0xff] }
  0x20   :  { %3157 = vmatmul.mubr.msk.f32.gmra.mrb[14].mxu0 %vm37_vm1, %v33_v30  ;;  %4031 = vmatprep.subr.bf16.mxu0 %v4030_v59  ;;  %v4052_v63 = vpack.c.bf16 %v3183_v53, %v3182_v52  ;;  %v4068_v53 = vpack.c.bf16 %v3191_v43, %v3190_v42 }
  0x23   :  { %4033 = vmatpush3.bf16.msra.mxu0 %v4032_v62 }
  0x24   :  { %4071 = vmatprep.subr.bf16.mxu0 %v4070_v5 }
  0xd7   :  { %v138_v7 = vpop.f32.mrb[0].mxu0 }
  0xd8   :  { %v3660_v11 = vpop.f32.mrb[0].mxu1  ;;  %v140_v12 = vpop.f32.mrb[1].mxu0  ;;  %v4583_v18 = vmax.f32 %v138_v7, 0.0  ;;  %v3203_v7 = vld [vmem:[%s5271_s2 + $0x1e8] sm:$0xff] }
  0xd9   :  { %v4579_v15 = vmax.f32 %v3660_v11, 0.0  ;;  %v4581_v16 = vmax.f32 %v140_v12, 0.0  ;;  %v251_v17 = vpop.f32.mrb[1].mxu1  ;;  %v4058_v12 = vpack.c.bf16 %v3203_v7, %v3202_v6 }
  0xda   :  { %v4585_v19 = vmax.f32 %v251_v17, 0.0 }
  0xdb   :  { %v144_v22 = vpop.f32.mrb[2].mxu0  ;;  %442 = vmatprep.mubr.f32.mxu0 %v4581_v16 }
  0xdc   :  { %v3663_v26 = vpop.f32.mrb[2].mxu1  ;;  %3674 = vmatprep.mubr.msk.f32.mxu1 %vm353_vm2, %v4585_v19  ;;  %v146_v27 = vpop.f32.mrb[3].mxu0  ;;  %443 = vmatmul.mubr.f32.vlgmr.msra.gmra.mrb[16].mxu0 %v4583_v18  ;;  %v4611_v33 = vmax.f32 %v144_v22, 0.0  ;;  %v3205_v22 = vld [vmem:[%s5271_s2 + $0x1f8] sm:$0xff] }
  0xdd   :  { %v4605_v30 = vmax.f32 %v3663_v26, 0.0  ;;  %v4607_v31 = vmax.f32 %v146_v27, 0.0  ;;  %v261_v32 = vpop.f32.mrb[3].mxu1  ;;  %3675 = vmatmul.mubr.msk.f32.vlgmr.msra.gmra.mrb[8].mxu1 %vm353_vm2, %v4579_v15  ;;  %4073 = vmatpush3.bf16.msra.mxu0 %v4070_v5 }
  0xde   :  { %v4613_v34 = vmax.f32 %v261_v32, 0.0  ;;  %4041 = vmatpush3.bf16.msra.mxu1 %v4040_v20  ;;  %4107 = vmatprep.subr.bf16.mxu0 %v4587_v21  ;;  %v3204_v20 = vld [vmem:[%s5271_s2 + $0x1f0] sm:$0xff] }
  0xdf   :  { %v150_v36 = vpop.f32.mrb[4].mxu0  ;;  %447 = vmatprep.mubr.f32.mxu0 %v4607_v31  ;;  %4043 = vmatprep.subr.bf16.mxu1 %v4042_v23  ;;  %v4062_v27 = vpack.c.bf16 %v3205_v22, %v3204_v20  ;;  %v3225_v22 = vld [vmem:[%s5271_s2 + $0x250] sm:$0xff] }
  0xe0   :  { %v3666_v40 = vpop.f32.mrb[4].mxu1  ;;  %3677 = vmatprep.mubr.msk.f32.mxu1 %vm353_vm2, %v4613_v34  ;;  %v152_v41 = vpop.f32.mrb[5].mxu0  ;;  %448 = vmatmul.mubr.f32.gmra.mrb[18].mxu0 %v4611_v33  ;;  %v4638_v47 = vmax.f32 %v150_v36, 0.0  ;;  %v3207_v36 = vld [vmem:[%s5271_s2 + $0x208] sm:$0xff] }
  0xe1   :  { %v4632_v44 = vmax.f32 %v3666_v40, 0.0  ;;  %v4634_v45 = vmax.f32 %v152_v41, 0.0  ;;  %v271_v46 = vpop.f32.mrb[5].mxu1  ;;  %3678 = vmatmul.mubr.msk.f32.gmra.mrb[10].mxu1 %vm353_vm2, %v4605_v30 }
  0xe2   :  { %v4640_v48 = vmax.f32 %v271_v46, 0.0  ;;  %4045 = vmatpush3.bf16.msra.mxu1 %v4044_v35  ;;  %v3206_v35 = vld [vmem:[%s5271_s2 + $0x200] sm:$0xff] }
  0xe3   :  { %v156_v50 = vpop.f32.mrb[6].mxu0  ;;  %452 = vmatprep.mubr.f32.mxu0 %v4634_v45  ;;  %4047 = vmatprep.subr.bf16.mxu1 %v4046_v37  ;;  %v4066_v41 = vpack.c.bf16 %v3207_v36, %v3206_v35  ;;  %v3227_v36 = vld [vmem:[%s5271_s2 + $0x260] sm:$0xff] }
  0xe4   :  { %v3669_v54 = vpop.f32.mrb[6].mxu1  ;;  %3680 = vmatprep.mubr.msk.f32.mxu1 %vm353_vm2, %v4640_v48  ;;  %v158_v55 = vpop.f32.mrb[7].mxu0  ;;  %453 = vmatmul.mubr.f32.gmra.mrb[20].mxu0 %v4638_v47  ;;  %v4664_v61 = vmax.f32 %v156_v50, 0.0  ;;  %v3236_v50 = vld [vmem:[%s5271_s2 + $0x2a8] sm:$0xff] }
  0xe5   :  { %v4658_v58 = vmax.f32 %v3669_v54, 0.0  ;;  %v4660_v59 = vmax.f32 %v158_v55, 0.0  ;;  %v281_v60 = vpop.f32.mrb[7].mxu1  ;;  %3681 = vmatmul.mubr.msk.f32.gmra.mrb[12].mxu1 %vm353_vm2, %v4632_v44  ;;  %v3219_v55 = vld [vmem:[%s5271_s2 + $0x220] sm:$0xff] }
  0xe6   :  { %v4666_v62 = vmax.f32 %v281_v60, 0.0  ;;  %4049 = vmatpush3.bf16.msra.mxu1 %v4048_v49  ;;  %v3235_v49 = vld [vmem:[%s5271_s2 + $0x2a0] sm:$0xff]  ;;  %v3238_v60 = vld [vmem:[%s5271_s2 + $0x2b8] sm:$0xff] }
  0xe7   :  { %v162_v0 = vpop.f32.mrb[8].mxu0  ;;  %457 = vmatprep.mubr.f32.mxu0 %v4660_v59  ;;  %4051 = vmatprep.subr.bf16.mxu1 %v4050_v51  ;;  %v4074_v54 = vpack.c.bf16 %v3236_v50, %v3235_v49  ;;  %v1092_v49 = vld [vmem:[%s5272_s3 + $0x18] sm:$0xff] }
  0xe8   :  { %3683 = vmatprep.mubr.msk.f32.mxu1 %vm353_vm2, %v4666_v62  ;;  %v164_v5 = vpop.f32.mrb[9].mxu0  ;;  %458 = vmatmul.mubr.f32.gmra.mrb[22].mxu0 %v4664_v61  ;;  %v4688_v9 = vmax.f32 %v162_v0, 0.0  ;;  %v4078_v0 = vpack.c.bf16 %v3238_v60, %v3237_v57  ;;  %v3263_v60 = vld [vmem:[%s5272_s3 + $0x28] sm:$0xff] }
  0xe9   :  { %v4684_v8 = vmax.f32 %v164_v5, 0.0  ;;  %3684 = vmatmul.mubr.msk.f32.gmra.mrb[14].mxu1 %vm353_vm2, %v4658_v58  ;;  %v3240_v5 = vld [vmem:[%s5271_s2 + $0x2c8] sm:$0xff] }
  0xea   :  { %4053 = vmatpush3.bf16.msra.mxu1 %v4052_v63  ;;  %692 = vmatprep.mubr.f32.mxu1 %v4581_v16  ;;  %v4076_v63 = vpack.c.bf16 %v3220_v56, %v3219_v55  ;;  %v4082_v7 = vpack.c.bf16 %v3240_v5, %v3239_v4  ;;  %v3248_v55 = vld [vmem:[%s5271_s2 + $0x308] sm:$0xff] }
  0xeb   :  { %v168_v11 = vpop.f32.mrb[10].mxu0  ;;  %462 = vmatprep.mubr.f32.mxu0 %v4684_v8  ;;  %4055 = vmatprep.subr.bf16.mxu1 %v4054_v1  ;;  %v3221_v1 = vld [vmem:[%s5271_s2 + $0x230] sm:$0xff] }
  0xec   :  { %v170_v17 = vpop.f32.mrb[11].mxu0  ;;  %463 = vmatmul.mubr.f32.gmra.mrb[24].mxu0 %v4688_v9  ;;  %v4707_v24 = vmax.f32 %v168_v11, 0.0  ;;  %v4080_v6 = vpack.c.bf16 %v3222_v2, %v3221_v1  ;;  %v3224_v11 = vld [vmem:[%s5271_s2 + $0x248] sm:$0xff]  ;;  %v3249_v2 = vld [vmem:[%s5271_s2 + $0x310] sm:$0xff] }
  0xed   :  { %v4705_v23 = vmax.f32 %v170_v17, 0.0  ;;  %v3232_v1 = vld [vmem:[%s5271_s2 + $0x288] sm:$0xff] }
  0xee   :  { %4057 = vmatpush3.bf16.msra.mxu1 %v4056_v10  ;;  %v3223_v10 = vld [vmem:[%s5271_s2 + $0x240] sm:$0xff] }
  0xef   :  { %v174_v26 = vpop.f32.mrb[12].mxu0  ;;  %467 = vmatprep.mubr.f32.mxu0 %v4705_v23  ;;  %4059 = vmatprep.subr.bf16.mxu1 %v4058_v12  ;;  %v3241_v12 = vld [vmem:[%s5271_s2 + $0x2d0] sm:$0xff]  ;;  %v4084_v17 = vpack.c.bf16 %v3224_v11, %v3223_v10  ;;  %v3234_v11 = vld [vmem:[%s5271_s2 + $0x298] sm:$0xff] }
  0xf0   :  { %v176_v32 = vpop.f32.mrb[13].mxu0  ;;  %468 = vmatmul.mubr.f32.gmra.mrb[26].mxu0 %v4707_v24  ;;  %v4725_v38 = vmax.f32 %v174_v26, 0.0  ;;  %v4086_v20 = vpack.c.bf16 %v3242_v13, %v3241_v12  ;;  %v3243_v26 = vld [vmem:[%s5271_s2 + $0x2e0] sm:$0xff]  ;;  %v3233_v10 = vld [vmem:[%s5271_s2 + $0x290] sm:$0xff] }
  0xf1   :  { %v4723_v37 = vmax.f32 %v176_v32, 0.0  ;;  %v1090_v32 = vld [vmem:[%s5272_s3 + $0x8] sm:$0xff]  ;;  %v4104_v13 = vpack.c.bf16 %v3234_v11, %v3233_v10 }
  0xf2   :  { %4061 = vmatpush3.bf16.msra.mxu1 %v4060_v25  ;;  %v3226_v25 = vld [vmem:[%s5271_s2 + $0x258] sm:$0xff]  ;;  %v4840_v42 = vpack.c.bf16 %v1090_v32, %v1089_v29 }
  0xf3   :  { %v180_v40 = vpop.f32.mrb[14].mxu0  ;;  %472 = vmatprep.mubr.f32.mxu0 %v4723_v37  ;;  %4063 = vmatprep.subr.bf16.mxu1 %v4062_v27  ;;  %v3244_v27 = vld [vmem:[%s5271_s2 + $0x2e8] sm:$0xff]  ;;  %v4088_v28 = vpack.c.bf16 %v3226_v25, %v3225_v22  ;;  %v3268_v25 = vld [vmem:[%s5272_s3 + $0x50] sm:$0xff] }
  0xf4   :  { %v182_v46 = vpop.f32.mrb[15].mxu0  ;;  %473 = vmatmul.mubr.f32.gmra.mrb[28].mxu0 %v4725_v38  ;;  %v4743_v52 = vmax.f32 %v180_v40, 0.0  ;;  %v4090_v35 = vpack.c.bf16 %v3244_v27, %v3243_v26  ;;  %v3245_v40 = vld [vmem:[%s5271_s2 + $0x2f0] sm:$0xff]  ;;  %v3269_v26 = vld [vmem:[%s5272_s3 + $0x58] sm:$0xff] }
  0xf5   :  { %v4741_v51 = vmax.f32 %v182_v46, 0.0  ;;  %v1091_v46 = vld [vmem:[%s5272_s3 + $0x10] sm:$0xff]  ;;  %v4942_v27 = vpack.c.bf16 %v3269_v26, %v3268_v25 }
  0xf6   :  { %4065 = vmatpush3.bf16.msra.mxu1 %v4064_v39  ;;  %v3228_v39 = vld [vmem:[%s5271_s2 + $0x268] sm:$0xff]  ;;  %v4865_v56 = vpack.c.bf16 %v1092_v49, %v1091_v46 }
  0xf7   :  { %477 = vmatprep.mubr.f32.mxu0 %v4741_v51  ;;  %4067 = vmatprep.subr.bf16.mxu1 %v4066_v41  ;;  %v3246_v41 = vld [vmem:[%s5271_s2 + $0x2f8] sm:$0xff]  ;;  %v4092_v43 = vpack.c.bf16 %v3228_v39, %v3227_v36 }
  0xf8   :  { %478 = vmatmul.mubr.f32.gmra.mrb[30].mxu0 %v4743_v52  ;;  %v4094_v50 = vpack.c.bf16 %v3246_v41, %v3245_v40 }
  0xf9   :  { %3690 = vmatprep.mubr.msk.f32.mxu0 %vm353_vm2, %v4585_v19 }
  0xfa   :  { %4069 = vmatpush3.bf16.msra.mxu1 %v4068_v53  ;;  %v3230_v53 = vld [vmem:[%s5271_s2 + $0x278] sm:$0xff] }
  0xfb   :  { %4075 = vmatprep.subr.bf16.mxu1 %v4074_v54  ;;  %v3247_v54 = vld [vmem:[%s5271_s2 + $0x300] sm:$0xff] }
  0xfc   :  { %3691 = vmatmul.mubr.msk.f32.vlgmr.msra.gmra.mrb[32].mxu0 %vm353_vm2, %v4579_v15 }
  0xfd   :  { %693 = vmatmul.mubr.f32.vlgmr.msra.gmra.mrb[16].mxu1 %v4583_v18  ;;  %4109 = vmatpush3.bf16.msra.mxu0 %v4587_v21 }
  0xfe   :  { %697 = vmatprep.mubr.f32.mxu1 %v4607_v31  ;;  %4077 = vmatpush3.bf16.msra.mxu1 %v4076_v63  ;;  %v4098_v63 = vpack.c.bf16 %v3248_v55, %v3247_v54 }
  0xff   :  { %3693 = vmatprep.mubr.msk.f32.mxu0 %vm353_vm2, %v4613_v34  ;;  %4079 = vmatprep.subr.bf16.mxu1 %v4078_v0  ;;  %v3231_v0 = vld [vmem:[%s5271_s2 + $0x280] sm:$0xff] }
 0x100   :  { %3694 = vmatmul.mubr.msk.f32.gmra.mrb[34].mxu0 %vm353_vm2, %v4605_v30  ;;  %4110 = vmatprep.subr.bf16.mxu0 %v4348_v14  ;;  %v4100_v5 = vpack.c.bf16 %v3232_v1, %v3231_v0 }
 0x101   :  { %698 = vmatmul.mubr.f32.gmra.mrb[18].mxu1 %v4611_v33  ;;  %3696 = vmatprep.mubr.msk.f32.mxu0 %vm353_vm2, %v4640_v48 }
 0x102   :  { %702 = vmatprep.mubr.f32.mxu1 %v4634_v45  ;;  %4081 = vmatpush3.bf16.msra.mxu1 %v4080_v6  ;;  %v3265_v6 = vld [vmem:[%s5272_s3 + $0x38] sm:$0xff] }
 0x103   :  { %4083 = vmatprep.subr.bf16.mxu1 %v4082_v7 }
 0x104   :  { %3697 = vmatmul.mubr.msk.f32.gmra.mrb[36].mxu0 %vm353_vm2, %v4632_v44 }
 0x105   :  { %703 = vmatmul.mubr.f32.gmra.mrb[20].mxu1 %v4638_v47  ;;  %3699 = vmatprep.mubr.msk.f32.mxu0 %vm353_vm2, %v4666_v62 }
 0x106   :  { %707 = vmatprep.mubr.f32.mxu1 %v4660_v59  ;;  %4085 = vmatpush3.bf16.msra.mxu1 %v4084_v17  ;;  %v3266_v17 = vld [vmem:[%s5272_s3 + $0x40] sm:$0xff] }
 0x107   :  { %4087 = vmatprep.subr.bf16.mxu1 %v4086_v20  ;;  %v3267_v20 = vld [vmem:[%s5272_s3 + $0x48] sm:$0xff] }
 0x108   :  { %3700 = vmatmul.mubr.msk.f32.gmra.mrb[38].mxu0 %vm353_vm2, %v4658_v58  ;;  %v4928_v22 = vpack.c.bf16 %v3267_v20, %v3266_v17  ;;  %v3210_v17 = vld [vmem:[%s5273_s4 + $0x1] ss:$0 sm:$0xff] }
 0x109   :  { %708 = vmatmul.mubr.f32.gmra.mrb[22].mxu1 %v4664_v61  ;;  %3706 = vmatprep.mubr.msk.f32.mxu0 %vm353_vm2, %v4585_v19  ;;  %v3229_v19 = vld [vmem:[%s5271_s2 + $0x270] sm:$0xff] }
 0x10a   :  { %712 = vmatprep.mubr.f32.mxu1 %v4684_v8  ;;  %4089 = vmatpush3.bf16.msra.mxu1 %v4088_v28  ;;  %v4096_v57 = vpack.c.bf16 %v3230_v53, %v3229_v19 }
 0x10b   :  { %4091 = vmatprep.subr.bf16.mxu1 %v4090_v35 }
 0x10c   :  { %3707 = vmatmul.mubr.msk.f32.vlgmr.msra.gmra.mrb[40].mxu0 %vm353_vm2, %v4579_v15  ;;  %v3262_v15 = vld [vmem:[%s5272_s3 + $0x20] sm:$0xff] }
 0x10d   :  { %713 = vmatmul.mubr.f32.gmra.mrb[24].mxu1 %v4688_v9  ;;  %4112 = vmatpush3.bf16.msra.mxu0 %v4840_v42  ;;  %v4893_v4 = vpack.c.bf16 %v3263_v60, %v3262_v15 }
 0x10e   :  { %717 = vmatprep.mubr.f32.mxu1 %v4705_v23  ;;  %4093 = vmatpush3.bf16.msra.mxu1 %v4092_v43 }
 0x10f   :  { %3709 = vmatprep.mubr.msk.f32.mxu0 %vm353_vm2, %v4613_v34  ;;  %4095 = vmatprep.subr.bf16.mxu1 %v4094_v50  ;;  %v3250_v34 = vld [vmem:[%s5271_s2 + $0x318] sm:$0xff] }
 0x110   :  { %4113 = vmatprep.subr.bf16.mxu0 %v4348_v14  ;;  %3710 = vmatmul.mubr.msk.f32.gmra.mrb[42].mxu0 %vm353_vm2, %v4605_v30  ;;  %v3264_v30 = vld [vmem:[%s5272_s3 + $0x30] sm:$0xff]  ;;  %v4102_v7 = vpack.c.bf16 %v3250_v34, %v3249_v2 }
 0x111   :  { %718 = vmatmul.mubr.f32.gmra.mrb[26].mxu1 %v4707_v24  ;;  %4115 = vmatpush3.bf16.msra.mxu0 %v4865_v56  ;;  %v4914_v12 = vpack.c.bf16 %v3265_v6, %v3264_v30 }
 0x112   :  { %722 = vmatprep.mubr.f32.mxu1 %v4723_v37  ;;  %4097 = vmatpush3.bf16.msra.mxu1 %v4096_v57 }
 0x113   :  { %4099 = vmatprep.subr.bf16.mxu1 %v4098_v63  ;;  %3726 = vmatprep.mubr.msk.f32.mxu0 %vm4349_vm3, %v4347_v3 }
 0x114   :  { %4116 = vmatprep.subr.bf16.mxu0 %v4348_v14  ;;  %3727 = vmatmul.mubr.f32.vlgmr.msra.gmra.mrb[44].mxu0 %v4347_v3 }
 0x115   :  { %723 = vmatmul.mubr.f32.gmra.mrb[28].mxu1 %v4725_v38  ;;  %4118 = vmatpush3.bf16.msra.mxu0 %v4893_v4 }
 0x116   :  { %727 = vmatprep.mubr.f32.mxu1 %v4741_v51  ;;  %4101 = vmatpush3.bf16.msra.mxu1 %v4100_v5 }
 0x117   :  { %4103 = vmatprep.subr.bf16.mxu1 %v4102_v7  ;;  %4119 = vmatprep.subr.bf16.mxu0 %v4348_v14 }
 0x118   :  { %3737 = vmatprep.mubr.msk.f32.mxu0 %vm4349_vm3, %v4347_v3 }
 0x119   :  { %728 = vmatmul.mubr.f32.gmra.mrb[30].mxu1 %v4743_v52  ;;  %4121 = vmatpush3.bf16.msra.mxu0 %v4914_v12 }
 0x11a   :  { %4105 = vmatpush3.bf16.msra.mxu1 %v4104_v13  ;;  %942 = vmatprep.mubr.f32.mxu1 %v4581_v16 }
 0x11b   :  { %4122 = vmatprep.subr.bf16.mxu0 %v4348_v14  ;;  %4262 = vmatprep.subr.bf16.mxu1 %v4587_v21 }
 0x11c   :  { %3738 = vmatmul.mubr.f32.vlgmr.msra.gmra.mrb[46].mxu0 %v4347_v3 }
 0x11d   :  { %943 = vmatmul.mubr.f32.vlgmr.msra.gmra.mrb[32].mxu1 %v4583_v18  ;;  %4124 = vmatpush3.bf16.msra.mxu0 %v4928_v22 }
 0x11e   :  { %947 = vmatprep.mubr.f32.mxu1 %v4607_v31  ;;  %4125 = vmatprep.subr.bf16.mxu0 %v4348_v14  ;;  %v3167_v31 = vld [vmem:[%s5273_s4] ss:$0 sm:$0xff] }
 0x11f   :  { %3748 = vmatprep.mubr.msk.f32.mxu0 %vm4349_vm3, %v4347_v3  ;;  %4263 = vmatpush3.bf16.msra.mxu1 %v4587_v21 }
 0x120   :  { %4128 = vmatprep.subr.bf16.mxu1 %v4348_v14 }
 0x121   :  { %948 = vmatmul.mubr.f32.gmra.mrb[34].mxu1 %v4611_v33  ;;  %4127 = vmatpush3.bf16.msra.mxu0 %v4942_v27 }
 0x122   :  { %952 = vmatprep.mubr.f32.mxu1 %v4634_v45  ;;  %4134 = vmatprep.subr.bf16.mxu0 %v4348_v14 }
 0x124   :  { %3749 = vmatmul.mubr.f32.vlgmr.msra.gmra.mrb[48].mxu0 %v4347_v3 }
 0x125   :  { %953 = vmatmul.mubr.f32.gmra.mrb[36].mxu1 %v4638_v47  ;;  %4136 = vmatpush3.bf16.msra.mxu0 %v4893_v4 }
 0x126   :  { %957 = vmatprep.mubr.f32.mxu1 %v4660_v59  ;;  %4137 = vmatprep.subr.bf16.mxu0 %v4348_v14 }
 0x127   :  { %3770 = vmatprep.mubr.msk.f32.mxu0 %vm4349_vm3, %v4347_v3 }
 0x129   :  { %958 = vmatmul.mubr.f32.gmra.mrb[38].mxu1 %v4664_v61  ;;  %4139 = vmatpush3.bf16.msra.mxu0 %v4914_v12 }
 0x12a   :  { %962 = vmatprep.mubr.f32.mxu1 %v4684_v8  ;;  %4146 = vmatprep.subr.bf16.mxu0 %v4348_v14 }
 0x12d   :  { %963 = vmatmul.mubr.f32.gmra.mrb[40].mxu1 %v4688_v9 }
 0x12e   :  { %967 = vmatprep.mubr.f32.mxu1 %v4705_v23 }
 0x131   :  { %968 = vmatmul.mubr.f32.gmra.mrb[42].mxu1 %v4707_v24 }
 0x132   :  { %972 = vmatprep.mubr.f32.mxu1 %v4723_v37 }
 0x135   :  { %973 = vmatmul.mubr.f32.gmra.mrb[44].mxu1 %v4725_v38 }
 0x136   :  { %977 = vmatprep.mubr.f32.mxu1 %v4741_v51 }
 0x139   :  { %978 = vmatmul.mubr.f32.gmra.mrb[46].mxu1 %v4743_v52 }
 0x13a   :  { %3712 = vmatprep.mubr.msk.f32.mxu1 %vm353_vm2, %v4640_v48 }
 0x13d   :  { %3713 = vmatmul.mubr.msk.f32.vlgmr.msra.gmra.mrb[48].mxu1 %vm353_vm2, %v4632_v44 }
 0x13e   :  { %3715 = vmatprep.mubr.msk.f32.mxu1 %vm353_vm2, %v4666_v62  ;;  %4130 = vmatpush3.bf16.msra.mxu1 %v4840_v42 }
 0x13f   :  { %4131 = vmatprep.subr.bf16.mxu1 %v4348_v14 }
 0x141   :  { %3716 = vmatmul.mubr.msk.f32.gmra.mrb[50].mxu1 %vm353_vm2, %v4658_v58 }
 0x142   :  { %4133 = vmatpush3.bf16.msra.mxu1 %v4865_v56  ;;  %3759 = vmatprep.mubr.msk.f32.mxu1 %vm4349_vm3, %v4347_v3 }
 0x143   :  { %4140 = vmatprep.subr.bf16.mxu1 %v4348_v14 }
 0x1af   :  { %v3358_v16 = vpop.f32.mrb[16].mxu0 }
 0x1b0   :  { %v3359_v18 = vpop.f32.mrb[17].mxu0  ;;  %v3676_v21 = vpop.f32.mrb[8].mxu1 }
 0x1b1   :  { %v3360_v33 = vadd.f32 %v3359_v18, %v3358_v16  ;;  %v549_v44 = vpop.f32.mrb[9].mxu1 }
 0x1b3   :  { %v3361_v45 = vpop.f32.mrb[18].mxu0  ;;  %v445_v47 = vadd.f32 %v3360_v33, %v3167_v31 }
 0x1b4   :  { %v3362_v48 = vpop.f32.mrb[19].mxu0  ;;  %v3679_v58 = vpop.f32.mrb[10].mxu1 }
 0x1b5   :  { %v3363_v59 = vadd.f32 %v3362_v48, %v3361_v45  ;;  %v4989_v61 = vadd.f32 %v549_v44, %v445_v47  ;;  %v559_v62 = vpop.f32.mrb[11].mxu1 }
 0x1b7   :  { %v450_v8 = vadd.f32 %v3363_v59, %v3167_v31  ;;  %v3364_v9 = vpop.f32.mrb[20].mxu0 }
 0x1b8   :  { %v3365_v23 = vpop.f32.mrb[21].mxu0  ;;  %v3682_v24 = vpop.f32.mrb[12].mxu1 }
 0x1b9   :  { %v3366_v37 = vadd.f32 %v3365_v23, %v3364_v9  ;;  %v569_v38 = vpop.f32.mrb[13].mxu1  ;;  %v4991_v51 = vadd.f32 %v3676_v21, %v450_v8 }
 0x1bb   :  { %v3367_v52 = vpop.f32.mrb[22].mxu0  ;;  %v455_v28 = vadd.f32 %v3366_v37, %v3167_v31 }
 0x1bc   :  { %v3368_v29 = vpop.f32.mrb[23].mxu0  ;;  %v3685_v32 = vpop.f32.mrb[14].mxu1 }
 0x1bd   :  { %v3369_v35 = vadd.f32 %v3368_v29, %v3367_v52  ;;  %v4993_v36 = vadd.f32 %v559_v62, %v455_v28  ;;  %v579_v39 = vpop.f32.mrb[15].mxu1 }
 0x1bf   :  { %v460_v40 = vadd.f32 %v3369_v35, %v3167_v31  ;;  %v3370_v41 = vpop.f32.mrb[24].mxu0 }
 0x1c0   :  { %v3371_v43 = vpop.f32.mrb[25].mxu0 }
 0x1c1   :  { %v3372_v46 = vadd.f32 %v3371_v43, %v3370_v41  ;;  %v4995_v49 = vadd.f32 %v3679_v58, %v460_v40 }
 0x1c3   :  { %v3373_v50 = vpop.f32.mrb[26].mxu0  ;;  %v465_v19 = vadd.f32 %v3372_v46, %v3167_v31 }
 0x1c4   :  { %v3374_v53 = vpop.f32.mrb[27].mxu0 }
 0x1c5   :  { %v3375_v54 = vadd.f32 %v3374_v53, %v3373_v50  ;;  %v4997_v55 = vadd.f32 %v569_v38, %v465_v19 }
 0x1c7   :  { %v470_v57 = vadd.f32 %v3375_v54, %v3167_v31  ;;  %v3376_v15 = vpop.f32.mrb[28].mxu0 }
 0x1c8   :  { %v3377_v60 = vpop.f32.mrb[29].mxu0 }
 0x1c9   :  { %v3378_v63 = vadd.f32 %v3377_v60, %v3376_v15  ;;  %v4999_v0 = vadd.f32 %v3682_v24, %v470_v57 }
 0x1cb   :  { %v3379_v1 = vpop.f32.mrb[30].mxu0  ;;  %v475_v2 = vadd.f32 %v3378_v63, %v3167_v31 }
 0x1cc   :  { %v3380_v34 = vpop.f32.mrb[31].mxu0 }
 0x1cd   :  { %v3381_v5 = vadd.f32 %v3380_v34, %v3379_v1  ;;  %v5001_v30 = vadd.f32 %v579_v39, %v475_v2 }
 0x1cf   :  { %v480_v6 = vadd.f32 %v3381_v5, %v3167_v31  ;;  %v3692_v7 = vpop.f32.mrb[32].mxu0 }
 0x1d0   :  { %v3424_v10 = vpop.f32.mrb[16].mxu1  ;;  %v799_v11 = vpop.f32.mrb[33].mxu0 }
 0x1d1   :  { %v3425_v13 = vpop.f32.mrb[17].mxu1  ;;  %v5006_v20 = vadd.f32 %v3685_v32, %v480_v6 }
 0x1d2   :  { %v3426_v25 = vadd.f32 %v3425_v13, %v3424_v10 }
 0x1d3   :  { %v3695_v26 = vpop.f32.mrb[34].mxu0 }
 0x1d4   :  { %v695_v16 = vadd.f32 %v3426_v25, %v3210_v17  ;;  %v3427_v18 = vpop.f32.mrb[18].mxu1  ;;  %v809_v21 = vpop.f32.mrb[35].mxu0 }
 0x1d5   :  { %v3428_v33 = vpop.f32.mrb[19].mxu1 }
 0x1d6   :  { %v800_v44 = vadd.f32 %v799_v11, %v695_v16  ;;  %v3429_v45 = vadd.f32 %v3428_v33, %v3427_v18 }
 0x1d7   :  { %v3698_v47 = vpop.f32.mrb[36].mxu0 }
 0x1d8   :  { %v700_v31 = vadd.f32 %v3429_v45, %v3210_v17  ;;  %v3430_v48 = vpop.f32.mrb[20].mxu1  ;;  %v819_v58 = vpop.f32.mrb[37].mxu0 }
 0x1d9   :  { %v3431_v59 = vpop.f32.mrb[21].mxu1 }
 0x1da   :  { %v3432_v62 = vadd.f32 %v3431_v59, %v3430_v48  ;;  %v5008_v8 = vadd.f32 %v3692_v7, %v700_v31 }
 0x1db   :  { %v3701_v9 = vpop.f32.mrb[38].mxu0 }
 0x1dc   :  { %v705_v23 = vadd.f32 %v3432_v62, %v3210_v17  ;;  %v3433_v24 = vpop.f32.mrb[22].mxu1  ;;  %v829_v37 = vpop.f32.mrb[39].mxu0 }
 0x1dd   :  { %v3434_v38 = vpop.f32.mrb[23].mxu1 }
 0x1de   :  { %v3435_v52 = vadd.f32 %v3434_v38, %v3433_v24  ;;  %v5010_v28 = vadd.f32 %v809_v21, %v705_v23 }
 0x1df   :  { %v3708_v29 = vpop.f32.mrb[40].mxu0 }
 0x1e0   :  { %v710_v32 = vadd.f32 %v3435_v52, %v3210_v17  ;;  %v3436_v35 = vpop.f32.mrb[24].mxu1  ;;  %v1049_v39 = vpop.f32.mrb[41].mxu0 }
 0x1e1   :  { %v3437_v40 = vpop.f32.mrb[25].mxu1 }
 0x1e2   :  { %v3438_v41 = vadd.f32 %v3437_v40, %v3436_v35  ;;  %v5012_v43 = vadd.f32 %v3695_v26, %v710_v32 }
 0x1e3   :  { %v3711_v46 = vpop.f32.mrb[42].mxu0 }
 0x1e4   :  { %v715_v50 = vadd.f32 %v3438_v41, %v3210_v17  ;;  %v3439_v19 = vpop.f32.mrb[26].mxu1  ;;  %v1059_v53 = vpop.f32.mrb[43].mxu0 }
 0x1e5   :  { %v3440_v54 = vpop.f32.mrb[27].mxu1 }
 0x1e6   :  { %v3441_v57 = vadd.f32 %v3440_v54, %v3439_v19  ;;  %v5014_v15 = vadd.f32 %v819_v58, %v715_v50 }
 0x1e7   :  { %v1173_v60 = vpop.f32.mrb[44].mxu0 }
 0x1e8   :  { %v720_v63 = vadd.f32 %v3441_v57, %v3210_v17  ;;  %v3442_v1 = vpop.f32.mrb[28].mxu1  ;;  %v1177_v2 = vadd.f32 %v1173_v60, %v4989_v61  ;;  %v3728_v34 = vpop.f32.mrb[45].mxu0  ;;  %v3253_v61 = vld [vmem:[%s5273_s4 + $0x2] ss:$0 sm:$0xff]  ;;  %v5031_v60 = vld [vmem:[%s5273_s4 + $0x3] ss:$0 sm:$0xff] }
 0x1e9   :  { %v3443_v5 = vpop.f32.mrb[29].mxu1 }
 0x1ea   :  { %v3444_v6 = vadd.f32 %v3443_v5, %v3442_v1  ;;  %v3270_v7 = vmul.f32 -1.442695, %v1177_v2  ;;  %v5017_v10 = vadd.f32 %v3698_v47, %v720_v63 }
 0x1ec   :  { %v725_v11 = vadd.f32 %v3444_v6, %v3210_v17  ;;  %4267 = vpow2.f32 %v3270_v7  ;;  %v3445_v13 = vpop.f32.mrb[30].mxu1 }
 0x1ed   :  { %v3446_v25 = vpop.f32.mrb[31].mxu1 }
 0x1ee   :  { %v3447_v26 = vadd.f32 %v3446_v25, %v3445_v13  ;;  %v5019_v16 = vadd.f32 %v829_v37, %v725_v11 }
 0x1ef   :  { %v1250_v18 = vpop.f32.mrb[46].mxu0 }
 0x1f0   :  { %v730_v21 = vadd.f32 %v3447_v26, %v3210_v17  ;;  %v3490_v33 = vpop.f32.mrb[32].mxu1  ;;  %v1254_v45 = vadd.f32 %v1250_v18, %v800_v44  ;;  %v3739_v31 = vpop.f32.mrb[47].mxu0 }
 0x1f1   :  { %v3491_v48 = vpop.f32.mrb[33].mxu1 }
 0x1f2   :  { %v3271_v58 = vmul.f32 -1.442695, %v1254_v45  ;;  %v3492_v47 = vadd.f32 %v3491_v48, %v3490_v33  ;;  %v5024_v59 = vadd.f32 %v3701_v9, %v730_v21 }
 0x1f4   :  { %4269 = vpow2.f32 %v3271_v58  ;;  %v945_v62 = vadd.f32 %v3492_v47, %v3253_v61  ;;  %v3493_v23 = vpop.f32.mrb[34].mxu1 }
 0x1f5   :  { %v3494_v24 = vpop.f32.mrb[35].mxu1 }
 0x1f6   :  { %v4268_v37 = vpop.eup %4267  ;;  %v1050_v38 = vadd.f32 %v1049_v39, %v945_v62  ;;  %v3495_v52 = vadd.f32 %v3494_v24, %v3493_v23 }
 0x1f7   :  { %v1181_v17 = vadd.f32 1.0, %v4268_v37  ;;  %v1331_v32 = vpop.f32.mrb[48].mxu0 }
 0x1f8   :  { %v950_v44 = vadd.f32 %v3495_v52, %v3253_v61  ;;  %v3496_v35 = vpop.f32.mrb[36].mxu1  ;;  %v3750_v40 = vpop.f32.mrb[49].mxu0  ;;  %v1332_v6 = vadd.f32 %v5031_v60, %v1331_v32 }
 0x1f9   :  { %4271 = vrcp.f32 %v1181_v17  ;;  %v3497_v41 = vpop.f32.mrb[37].mxu1 }
 0x1fa   :  { %v5026_v50 = vadd.f32 %v3708_v29, %v950_v44  ;;  %v3498_v19 = vadd.f32 %v3497_v41, %v3496_v35 }
 0x1fc   :  { %v955_v54 = vadd.f32 %v3498_v19, %v3253_v61  ;;  %v3499_v9 = vpop.f32.mrb[38].mxu1 }
 0x1fd   :  { %v3500_v57 = vpop.f32.mrb[39].mxu1 }
 0x1fe   :  { %v4270_v39 = vpop.eup %4269  ;;  %v5033_v63 = vadd.f32 %v1059_v53, %v955_v54  ;;  %v3501_v1 = vadd.f32 %v3500_v57, %v3499_v9 }
 0x1ff   :  { %v1258_v2 = vadd.f32 1.0, %v4270_v39 }
 0x200   :  { %v960_v34 = vadd.f32 %v3501_v1, %v3253_v61  ;;  %v3502_v5 = vpop.f32.mrb[40].mxu1 }
 0x201   :  { %v3503_v29 = vpop.f32.mrb[41].mxu1  ;;  %4273 = vrcp.f32 %v1258_v2 }
 0x202   :  { %v5036_v7 = vadd.f32 %v3711_v46, %v960_v34  ;;  %v3504_v11 = vadd.f32 %v3503_v29, %v3502_v5 }
 0x203   :  { %v4272_v13 = vpop.eup %4271 }
 0x204   :  { %v1335_v25 = vmul.f32 %v4272_v13, %v1332_v6  ;;  %v3505_v26 = vpop.f32.mrb[42].mxu1  ;;  %v965_v18 = vadd.f32 %v3504_v11, %v3253_v61 }
 0x205   :  { %v3506_v21 = vpop.f32.mrb[43].mxu1 }
 0x206   :  { %v1336_v33 = vadd.f32 %v1335_v25, %v1050_v38  ;;  %v3507_v45 = vadd.f32 %v3506_v21, %v3505_v26 }
 0x208   :  { %4275 = vtanh.f32 %v1336_v33  ;;  %v3508_v53 = vpop.f32.mrb[44].mxu1  ;;  %v970_v31 = vadd.f32 %v3507_v45, %v3253_v61 }
 0x209   :  { %v3509_v48 = vpop.f32.mrb[45].mxu1 }
 0x20a   :  { %v3510_v58 = vadd.f32 %v3509_v48, %v3508_v53 }
 0x20b   :  { %v4274_v24 = vpop.eup %4273 }
 0x20c   :  { %v3511_v47 = vpop.f32.mrb[46].mxu1  ;;  %v975_v62 = vadd.f32 %v3510_v58, %v3253_v61  ;;  %v1338_v17 = vsub.f32 1.0, %v4274_v24  ;;  %v1340_v38 = vmul.f32 0.0, %v4274_v24 }
 0x20d   :  { %v3512_v23 = vpop.f32.mrb[47].mxu1 }
 0x20e   :  { %v3513_v46 = vadd.f32 %v3512_v23, %v3511_v47 }
 0x210   :  { %v3714_v37 = vpop.f32.mrb[48].mxu1  ;;  %v980_v52 = vadd.f32 %v3513_v46, %v3253_v61 }
 0x211   :  { %v5038_v32 = vadd.f32 %v3714_v37, %v970_v31  ;;  %v1069_v44 = vpop.f32.mrb[49].mxu1 }
 0x212   :  { %v4276_v35 = vpop.eup %4275  ;;  %v5040_v40 = vadd.f32 %v1069_v44, %v965_v18 }
 0x213   :  { %v1339_v41 = vmul.f32 %v4276_v35, %v1338_v17 }
 0x214   :  { %v3717_v19 = vpop.f32.mrb[50].mxu1 }
 0x215   :  { %v5042_v54 = vadd.f32 %v3717_v19, %v980_v52  ;;  %v1079_v9 = vpop.f32.mrb[51].mxu1  ;;  %v1341_v57 = vadd.f32 %v1340_v38, %v1339_v41 }
 0x216   :  { %v5044_v39 = vadd.f32 %v1079_v9, %v975_v62 }
 0x217   :  { %1342 = vst.msk [vmem:[#allocation2] sm:$0xff] %vm1103_vm4, %v1341_v57  ;;  %3760 = vmatmul.mubr.msk.f32.vlgmr.msra.gmra.mrb[52].mxu1 %vm1103_vm4, %v1341_v57  ;;  %3771 = vmatmul.mubr.msk.f32.vlgmr.msra.gmra.mrb[50].mxu0 %vm1103_vm4, %v1341_v57 }
 0x218   :  { %4142 = vmatpush3.bf16.msra.mxu1 %v4928_v22  ;;  %3781 = vmatprep.mubr.msk.f32.mxu1 %vm4349_vm3, %v4347_v3 }
 0x219   :  { %4143 = vmatprep.subr.bf16.mxu1 %v4348_v14  ;;  %4148 = vmatpush3.bf16.msra.mxu0 %v4840_v42 }
 0x21a   :  { %4149 = vmatprep.subr.bf16.mxu0 %v4348_v14  ;;  %3792 = vmatprep.mubr.msk.f32.mxu0 %vm4349_vm3, %v4347_v3 }
 0x21c   :  { %4145 = vmatpush3.bf16.msra.mxu1 %v4942_v27 }
 0x21d   :  { %4152 = vmatprep.subr.bf16.mxu1 %v4348_v14  ;;  %4151 = vmatpush3.bf16.msra.mxu0 %v4865_v56 }
 0x21e   :  { %4158 = vmatprep.subr.bf16.mxu0 %v4348_v14 }
 0x21f   :  { %3782 = vmatmul.mubr.msk.f32.vlgmr.msra.gmra.mrb[54].mxu1 %vm1103_vm4, %v1341_v57 }
 0x220   :  { %4154 = vmatpush3.bf16.msra.mxu1 %v4893_v4  ;;  %3803 = vmatprep.mubr.msk.f32.mxu1 %vm4349_vm3, %v4347_v3 }
 0x221   :  { %4155 = vmatprep.subr.bf16.mxu1 %v4348_v14 }
 0x224   :  { %4157 = vmatpush3.bf16.msra.mxu1 %v4914_v12 }
 0x225   :  { %4164 = vmatprep.subr.bf16.mxu1 %v4348_v14 }
 0x2ea   :  { %v1412_v61 = vpop.f32.mrb[52].mxu1  ;;  %v1489_v1 = vpop.f32.mrb[50].mxu0 }
 0x2eb   :  { %v1416_v2 = vadd.f32 %v1412_v61, %v4991_v51  ;;  %v1493_v34 = vadd.f32 %v1489_v1, %v5008_v8  ;;  %v3761_v5 = vpop.f32.mrb[53].mxu1  ;;  %v3772_v6 = vpop.f32.mrb[51].mxu0 }
 0x2ed   :  { %v3274_v29 = vmul.f32 -1.442695, %v1416_v2  ;;  %v3276_v11 = vmul.f32 -1.442695, %v1493_v34 }
 0x2ef   :  { %4277 = vpow2.f32 %v3274_v29 }
 0x2f0   :  { %4279 = vpow2.f32 %v3276_v11 }
 0x2f2   :  { %v1566_v13 = vpop.f32.mrb[54].mxu1 }
 0x2f3   :  { %v3783_v25 = vpop.f32.mrb[55].mxu1  ;;  %v1567_v45 = vadd.f32 %v5031_v60, %v1566_v13 }
 0x2f9   :  { %v4278_v26 = vpop.eup %4277 }
 0x2fa   :  { %v1420_v18 = vadd.f32 1.0, %v4278_v26  ;;  %v4280_v21 = vpop.eup %4279 }
 0x2fb   :  { %v1497_v33 = vadd.f32 1.0, %v4280_v21 }
 0x2fc   :  { %4281 = vrcp.f32 %v1420_v18 }
 0x2fd   :  { %4283 = vrcp.f32 %v1497_v33 }
 0x306   :  { %v4282_v53 = vpop.eup %4281 }
 0x307   :  { %v1570_v51 = vmul.f32 %v4282_v53, %v1567_v45  ;;  %v4284_v31 = vpop.eup %4283 }
 0x308   :  { %v1573_v48 = vsub.f32 1.0, %v4284_v31  ;;  %v1575_v62 = vmul.f32 %v4284_v31, %v1341_v57 }
 0x309   :  { %v1571_v8 = vadd.f32 %v1570_v51, %v5026_v50 }
 0x30b   :  { %4285 = vtanh.f32 %v1571_v8 }
 0x315   :  { %v4286_v58 = vpop.eup %4285 }
 0x316   :  { %v1574_v47 = vmul.f32 %v4286_v58, %v1573_v48 }
 0x318   :  { %v1576_v23 = vadd.f32 %v1575_v62, %v1574_v47 }
 0x31a   :  { %1577 = vst.msk [vmem:[#allocation2 + $0x8] sm:$0xff] %vm1103_vm4, %v1576_v23  ;;  %3793 = vmatmul.mubr.msk.f32.vlgmr.msra.gmra.mrb[52].mxu0 %vm1103_vm4, %v1576_v23  ;;  %3804 = vmatmul.mubr.msk.f32.vlgmr.msra.gmra.mrb[56].mxu1 %vm1103_vm4, %v1576_v23 }
 0x31b   :  { %4160 = vmatpush3.bf16.msra.mxu0 %v4928_v22  ;;  %3814 = vmatprep.mubr.msk.f32.mxu0 %vm4349_vm3, %v4347_v3 }
 0x31c   :  { %4161 = vmatprep.subr.bf16.mxu0 %v4348_v14  ;;  %4166 = vmatpush3.bf16.msra.mxu1 %v4840_v42 }
 0x31d   :  { %4167 = vmatprep.subr.bf16.mxu1 %v4348_v14  ;;  %3825 = vmatprep.mubr.msk.f32.mxu1 %vm4349_vm3, %v4347_v3 }
 0x31f   :  { %4163 = vmatpush3.bf16.msra.mxu0 %v4942_v27 }
 0x320   :  { %4170 = vmatprep.subr.bf16.mxu0 %v4348_v14  ;;  %4169 = vmatpush3.bf16.msra.mxu1 %v4865_v56 }
 0x321   :  { %4176 = vmatprep.subr.bf16.mxu1 %v4348_v14 }
 0x322   :  { %3815 = vmatmul.mubr.msk.f32.vlgmr.msra.gmra.mrb[54].mxu0 %vm1103_vm4, %v1576_v23 }
 0x323   :  { %4172 = vmatpush3.bf16.msra.mxu0 %v4893_v4  ;;  %3836 = vmatprep.mubr.msk.f32.mxu0 %vm4349_vm3, %v4347_v3 }
 0x324   :  { %4173 = vmatprep.subr.bf16.mxu0 %v4348_v14 }
 0x327   :  { %4175 = vmatpush3.bf16.msra.mxu0 %v4914_v12 }
 0x328   :  { %4182 = vmatprep.subr.bf16.mxu0 %v4348_v14 }
 0x3ed   :  { %v1647_v50 = vpop.f32.mrb[52].mxu0  ;;  %v1724_v24 = vpop.f32.mrb[56].mxu1 }
 0x3ee   :  { %v1651_v46 = vadd.f32 %v1647_v50, %v4993_v36  ;;  %v1728_v37 = vadd.f32 %v1724_v24, %v5010_v28  ;;  %v3794_v52 = vpop.f32.mrb[53].mxu0  ;;  %v3805_v17 = vpop.f32.mrb[57].mxu1 }
 0x3f0   :  { %v3279_v44 = vmul.f32 -1.442695, %v1651_v46  ;;  %v3281_v35 = vmul.f32 -1.442695, %v1728_v37 }
 0x3f2   :  { %4287 = vpow2.f32 %v3279_v44 }
 0x3f3   :  { %4289 = vpow2.f32 %v3281_v35 }
 0x3f5   :  { %v1801_v38 = vpop.f32.mrb[54].mxu0 }
 0x3f6   :  { %v3816_v41 = vpop.f32.mrb[55].mxu0  ;;  %v1802_v1 = vadd.f32 %v5031_v60, %v1801_v38 }
 0x3fc   :  { %v4288_v19 = vpop.eup %4287 }
 0x3fd   :  { %v1655_v9 = vadd.f32 1.0, %v4288_v19  ;;  %v4290_v57 = vpop.eup %4289 }
 0x3fe   :  { %v1732_v61 = vadd.f32 1.0, %v4290_v57 }
 0x3ff   :  { %4291 = vrcp.f32 %v1655_v9 }
 0x400   :  { %4293 = vrcp.f32 %v1732_v61 }
 0x409   :  { %v4292_v2 = vpop.eup %4291 }
 0x40a   :  { %v1805_v36 = vmul.f32 %v4292_v2, %v1802_v1  ;;  %v4294_v34 = vpop.eup %4293 }
 0x40b   :  { %v1808_v5 = vsub.f32 1.0, %v4294_v34  ;;  %v1810_v11 = vmul.f32 %v4294_v34, %v1576_v23 }
 0x40c   :  { %v1806_v28 = vadd.f32 %v1805_v36, %v5033_v63 }
 0x40e   :  { %4295 = vtanh.f32 %v1806_v28 }
 0x418   :  { %v4296_v6 = vpop.eup %4295 }
 0x419   :  { %v1809_v29 = vmul.f32 %v4296_v6, %v1808_v5 }
 0x41b   :  { %v1811_v13 = vadd.f32 %v1810_v11, %v1809_v29 }
 0x41d   :  { %1812 = vst.msk [vmem:[#allocation2 + $0x10] sm:$0xff] %vm1103_vm4, %v1811_v13  ;;  %3826 = vmatmul.mubr.msk.f32.vlgmr.msra.gmra.mrb[58].mxu1 %vm1103_vm4, %v1811_v13  ;;  %3837 = vmatmul.mubr.msk.f32.vlgmr.msra.gmra.mrb[56].mxu0 %vm1103_vm4, %v1811_v13 }
 0x41e   :  { %4178 = vmatpush3.bf16.msra.mxu1 %v4928_v22  ;;  %3847 = vmatprep.mubr.msk.f32.mxu1 %vm4349_vm3, %v4347_v3 }
 0x41f   :  { %4179 = vmatprep.subr.bf16.mxu1 %v4348_v14  ;;  %4184 = vmatpush3.bf16.msra.mxu0 %v4840_v42 }
 0x420   :  { %4185 = vmatprep.subr.bf16.mxu0 %v4348_v14  ;;  %3858 = vmatprep.mubr.msk.f32.mxu0 %vm4349_vm3, %v4347_v3 }
 0x422   :  { %4181 = vmatpush3.bf16.msra.mxu1 %v4942_v27 }
 0x423   :  { %4188 = vmatprep.subr.bf16.mxu1 %v4348_v14  ;;  %4187 = vmatpush3.bf16.msra.mxu0 %v4865_v56 }
 0x424   :  { %4194 = vmatprep.subr.bf16.mxu0 %v4348_v14 }
 0x425   :  { %3848 = vmatmul.mubr.msk.f32.vlgmr.msra.gmra.mrb[60].mxu1 %vm1103_vm4, %v1811_v13 }
 0x426   :  { %4190 = vmatpush3.bf16.msra.mxu1 %v4893_v4  ;;  %3869 = vmatprep.mubr.msk.f32.mxu1 %vm4349_vm3, %v4347_v3 }
 0x427   :  { %4191 = vmatprep.subr.bf16.mxu1 %v4348_v14 }
 0x42a   :  { %4193 = vmatpush3.bf16.msra.mxu1 %v4914_v12 }
 0x42b   :  { %4200 = vmatprep.subr.bf16.mxu1 %v4348_v14 }
 0x4f0   :  { %v1882_v63 = vpop.f32.mrb[58].mxu1  ;;  %v1959_v25 = vpop.f32.mrb[56].mxu0 }
 0x4f1   :  { %v1886_v26 = vadd.f32 %v1882_v63, %v4995_v49  ;;  %v1963_v18 = vadd.f32 %v1959_v25, %v5012_v43  ;;  %v3827_v21 = vpop.f32.mrb[59].mxu1  ;;  %v3838_v33 = vpop.f32.mrb[57].mxu0 }
 0x4f3   :  { %v3284_v45 = vmul.f32 -1.442695, %v1886_v26  ;;  %v3286_v53 = vmul.f32 -1.442695, %v1963_v18 }
 0x4f5   :  { %4297 = vpow2.f32 %v3284_v45 }
 0x4f6   :  { %4299 = vpow2.f32 %v3286_v53 }
 0x4f8   :  { %v2036_v51 = vpop.f32.mrb[60].mxu1 }
 0x4f9   :  { %v3849_v8 = vpop.f32.mrb[61].mxu1  ;;  %v2037_v62 = vadd.f32 %v5031_v60, %v2036_v51 }
 0x4ff   :  { %v4298_v31 = vpop.eup %4297 }
 0x500   :  { %v1890_v48 = vadd.f32 1.0, %v4298_v31  ;;  %v4300_v58 = vpop.eup %4299 }
 0x501   :  { %v1967_v47 = vadd.f32 1.0, %v4300_v58 }
 0x502   :  { %4301 = vrcp.f32 %v1890_v48 }
 0x503   :  { %4303 = vrcp.f32 %v1967_v47 }
 0x50c   :  { %v4302_v23 = vpop.eup %4301 }
 0x50d   :  { %v2040_v49 = vmul.f32 %v4302_v23, %v2037_v62  ;;  %v4304_v50 = vpop.eup %4303 }
 0x50e   :  { %v2043_v24 = vsub.f32 1.0, %v4304_v50  ;;  %v2045_v52 = vmul.f32 %v4304_v50, %v1811_v13 }
 0x50f   :  { %v2041_v43 = vadd.f32 %v2040_v49, %v5036_v7 }
 0x511   :  { %4305 = vtanh.f32 %v2041_v43 }
 0x51b   :  { %v4306_v46 = vpop.eup %4305 }
 0x51c   :  { %v2044_v37 = vmul.f32 %v4306_v46, %v2043_v24 }
 0x51e   :  { %v2046_v17 = vadd.f32 %v2045_v52, %v2044_v37 }
 0x520   :  { %2047 = vst.msk [vmem:[#allocation2 + $0x18] sm:$0xff] %vm1103_vm4, %v2046_v17  ;;  %3859 = vmatmul.mubr.msk.f32.vlgmr.msra.gmra.mrb[58].mxu0 %vm1103_vm4, %v2046_v17  ;;  %3870 = vmatmul.mubr.msk.f32.vlgmr.msra.gmra.mrb[62].mxu1 %vm1103_vm4, %v2046_v17 }
 0x521   :  { %4196 = vmatpush3.bf16.msra.mxu0 %v4928_v22  ;;  %3880 = vmatprep.mubr.msk.f32.mxu0 %vm4349_vm3, %v4347_v3 }
 0x522   :  { %4197 = vmatprep.subr.bf16.mxu0 %v4348_v14  ;;  %4202 = vmatpush3.bf16.msra.mxu1 %v4840_v42 }
 0x523   :  { %4203 = vmatprep.subr.bf16.mxu1 %v4348_v14  ;;  %3891 = vmatprep.mubr.msk.f32.mxu1 %vm4349_vm3, %v4347_v3 }
 0x525   :  { %4199 = vmatpush3.bf16.msra.mxu0 %v4942_v27 }
 0x526   :  { %4206 = vmatprep.subr.bf16.mxu0 %v4348_v14  ;;  %4205 = vmatpush3.bf16.msra.mxu1 %v4865_v56 }
 0x527   :  { %4212 = vmatprep.subr.bf16.mxu1 %v4348_v14 }
 0x528   :  { %3881 = vmatmul.mubr.msk.f32.vlgmr.msra.gmra.mrb[60].mxu0 %vm1103_vm4, %v2046_v17 }
 0x529   :  { %4208 = vmatpush3.bf16.msra.mxu0 %v4893_v4  ;;  %3902 = vmatprep.mubr.msk.f32.mxu0 %vm4349_vm3, %v4347_v3 }
 0x52a   :  { %4209 = vmatprep.subr.bf16.mxu0 %v4348_v14 }
 0x52d   :  { %4211 = vmatpush3.bf16.msra.mxu0 %v4914_v12 }
 0x52e   :  { %4218 = vmatprep.subr.bf16.mxu0 %v4348_v14 }
 0x5f3   :  { %v2117_v7 = vpop.f32.mrb[58].mxu0  ;;  %v2194_v44 = vpop.f32.mrb[62].mxu1 }
 0x5f4   :  { %v2121_v35 = vadd.f32 %v2117_v7, %v4997_v55  ;;  %v2198_v38 = vadd.f32 %v2194_v44, %v5014_v15  ;;  %v3860_v41 = vpop.f32.mrb[59].mxu0  ;;  %v3871_v19 = vpop.f32.mrb[63].mxu1 }
 0x5f6   :  { %v3289_v9 = vmul.f32 -1.442695, %v2121_v35  ;;  %v3291_v57 = vmul.f32 -1.442695, %v2198_v38 }
 0x5f8   :  { %4307 = vpow2.f32 %v3289_v9 }
 0x5f9   :  { %4309 = vpow2.f32 %v3291_v57 }
 0x5fb   :  { %v2271_v61 = vpop.f32.mrb[60].mxu0 }
 0x5fc   :  { %v3882_v1 = vpop.f32.mrb[61].mxu0  ;;  %v2272_v5 = vadd.f32 %v5031_v60, %v2271_v61 }
 0x602   :  { %v4308_v2 = vpop.eup %4307 }
 0x603   :  { %v2125_v36 = vadd.f32 1.0, %v4308_v2  ;;  %v4310_v28 = vpop.eup %4309 }
 0x604   :  { %v2202_v34 = vadd.f32 1.0, %v4310_v28 }
 0x605   :  { %4311 = vrcp.f32 %v2125_v36 }
 0x606   :  { %4313 = vrcp.f32 %v2202_v34 }
 0x60f   :  { %v4312_v6 = vpop.eup %4311 }
 0x610   :  { %v2275_v55 = vmul.f32 %v4312_v6, %v2272_v5  ;;  %v4314_v29 = vpop.eup %4313 }
 0x611   :  { %v2278_v11 = vsub.f32 1.0, %v4314_v29  ;;  %v2280_v25 = vmul.f32 %v4314_v29, %v2046_v17 }
 0x612   :  { %v2276_v15 = vadd.f32 %v2275_v55, %v5040_v40 }
 0x614   :  { %4315 = vtanh.f32 %v2276_v15 }
 0x61e   :  { %v4316_v13 = vpop.eup %4315 }
 0x61f   :  { %v2279_v63 = vmul.f32 %v4316_v13, %v2278_v11  ;;  %v2998_v11 = vld [vmem:[%s5274_s5 + $0x10] sm:$0xff]  ;;  %v2999_v13 = vld [vmem:[%s5274_s5 + $0x18] sm:$0xff] }
 0x621   :  { %v2281_v26 = vadd.f32 %v2280_v25, %v2279_v63  ;;  %v4258_v25 = vpack.c.bf16 %v2999_v13, %v2998_v11 }
 0x623   :  { %2282 = vst.msk [vmem:[#allocation2 + $0x20] sm:$0xff] %vm1103_vm4, %v2281_v26  ;;  %3892 = vmatmul.mubr.msk.f32.vlgmr.msra.gmra.mrb[64].mxu1 %vm1103_vm4, %v2281_v26  ;;  %3903 = vmatmul.mubr.msk.f32.vlgmr.msra.gmra.mrb[62].mxu0 %vm1103_vm4, %v2281_v26 }
 0x624   :  { %4214 = vmatpush3.bf16.msra.mxu1 %v4928_v22  ;;  %3913 = vmatprep.mubr.msk.f32.mxu1 %vm4349_vm3, %v4347_v3 }
 0x625   :  { %4215 = vmatprep.subr.bf16.mxu1 %v4348_v14  ;;  %4220 = vmatpush3.bf16.msra.mxu0 %v4840_v42 }
 0x626   :  { %4221 = vmatprep.subr.bf16.mxu0 %v4348_v14  ;;  %3924 = vmatprep.mubr.msk.f32.mxu0 %vm4349_vm3, %v4347_v3 }
 0x628   :  { %4217 = vmatpush3.bf16.msra.mxu1 %v4942_v27 }
 0x629   :  { %4224 = vmatprep.subr.bf16.mxu1 %v4348_v14  ;;  %4223 = vmatpush3.bf16.msra.mxu0 %v4865_v56 }
 0x62a   :  { %4230 = vmatprep.subr.bf16.mxu0 %v4348_v14 }
 0x62b   :  { %3914 = vmatmul.mubr.msk.f32.vlgmr.msra.gmra.mrb[66].mxu1 %vm1103_vm4, %v2281_v26 }
 0x62c   :  { %4226 = vmatpush3.bf16.msra.mxu1 %v4893_v4  ;;  %3935 = vmatprep.mubr.msk.f32.mxu1 %vm4349_vm3, %v4347_v3 }
 0x62d   :  { %4227 = vmatprep.subr.bf16.mxu1 %v4348_v14 }
 0x630   :  { %4229 = vmatpush3.bf16.msra.mxu1 %v4914_v12 }
 0x631   :  { %4236 = vmatprep.subr.bf16.mxu1 %v4348_v14 }
 0x6f6   :  { %v2352_v40 = vpop.f32.mrb[64].mxu1  ;;  %v2429_v18 = vpop.f32.mrb[62].mxu0 }
 0x6f7   :  { %v2356_v21 = vadd.f32 %v2352_v40, %v4999_v0  ;;  %v2433_v33 = vadd.f32 %v2429_v18, %v5017_v10  ;;  %v3893_v45 = vpop.f32.mrb[65].mxu1  ;;  %v3904_v53 = vpop.f32.mrb[63].mxu0  ;;  %v2991_v40 = vld [vmem:[#allocation2 + $0x18] sm:$0xff] }
 0x6f9   :  { %v3294_v51 = vmul.f32 -1.442695, %v2356_v21  ;;  %v3296_v8 = vmul.f32 -1.442695, %v2433_v33 }
 0x6fb   :  { %4317 = vpow2.f32 %v3294_v51 }
 0x6fc   :  { %4319 = vpow2.f32 %v3296_v8 }
 0x6fe   :  { %v2506_v31 = vpop.f32.mrb[66].mxu1 }
 0x6ff   :  { %v3915_v48 = vpop.f32.mrb[67].mxu1  ;;  %v2507_v49 = vadd.f32 %v5031_v60, %v2506_v31  ;;  %v3308_v31 = vld [vmem:[%s5275_s6] ss:$0 sm:$0xff] }
 0x705   :  { %v4318_v58 = vpop.eup %4317 }
 0x706   :  { %v2360_v47 = vadd.f32 1.0, %v4318_v58  ;;  %v4320_v62 = vpop.eup %4319 }
 0x707   :  { %v2437_v23 = vadd.f32 1.0, %v4320_v62 }
 0x708   :  { %4321 = vrcp.f32 %v2360_v47 }
 0x709   :  { %4323 = vrcp.f32 %v2437_v23 }
 0x712   :  { %v4322_v43 = vpop.eup %4321 }
 0x713   :  { %v2510_v0 = vmul.f32 %v4322_v43, %v2507_v49  ;;  %v4324_v50 = vpop.eup %4323 }
 0x714   :  { %v2513_v24 = vsub.f32 1.0, %v4324_v50  ;;  %v2515_v52 = vmul.f32 %v4324_v50, %v2281_v26  ;;  %v2989_v26 = vld [vmem:[#allocation2 + $0x8] sm:$0xff] }
 0x715   :  { %v2511_v10 = vadd.f32 %v2510_v0, %v5038_v32 }
 0x717   :  { %4325 = vtanh.f32 %v2511_v10 }
 0x721   :  { %v4326_v46 = vpop.eup %4325 }
 0x722   :  { %v2514_v37 = vmul.f32 %v4326_v46, %v2513_v24 }
 0x724   :  { %v2516_v17 = vadd.f32 %v2515_v52, %v2514_v37 }
 0x726   :  { %2517 = vst.msk [vmem:[#allocation2 + $0x28] sm:$0xff] %vm1103_vm4, %v2516_v17  ;;  %3925 = vmatmul.mubr.msk.f32.vlgmr.msra.gmra.mrb[64].mxu0 %vm1103_vm4, %v2516_v17  ;;  %3936 = vmatmul.mubr.msk.f32.vlgmr.msra.gmra.mrb[68].mxu1 %vm1103_vm4, %v2516_v17 }
 0x727   :  { %4232 = vmatpush3.bf16.msra.mxu0 %v4928_v22  ;;  %3946 = vmatprep.mubr.msk.f32.mxu0 %vm4349_vm3, %v4347_v3 }
 0x728   :  { %4233 = vmatprep.subr.bf16.mxu0 %v4348_v14  ;;  %4238 = vmatpush3.bf16.msra.mxu1 %v4840_v42  ;;  %v2996_v42 = vld [vmem:[%s5274_s5] sm:$0xff] }
 0x729   :  { %4239 = vmatprep.subr.bf16.mxu1 %v4348_v14  ;;  %3957 = vmatprep.mubr.msk.f32.mxu1 %vm4349_vm3, %v4347_v3 }
 0x72b   :  { %4235 = vmatpush3.bf16.msra.mxu0 %v4942_v27 }
 0x72c   :  { %4242 = vmatprep.subr.bf16.mxu0 %v4348_v14  ;;  %4241 = vmatpush3.bf16.msra.mxu1 %v4865_v56  ;;  %v2997_v56 = vld [vmem:[%s5274_s5 + $0x8] sm:$0xff] }
 0x72d   :  { %4248 = vmatprep.subr.bf16.mxu1 %v4348_v14  ;;  %v4254_v32 = vpack.c.bf16 %v2997_v56, %v2996_v42  ;;  %v2993_v18 = vld [vmem:[#allocation2 + $0x28] sm:$0xff] }
 0x72e   :  { %3947 = vmatmul.mubr.msk.f32.vlgmr.msra.gmra.mrb[66].mxu0 %vm1103_vm4, %v2516_v17 }
 0x72f   :  { %4244 = vmatpush3.bf16.msra.mxu0 %v4893_v4  ;;  %3968 = vmatprep.mubr.msk.f32.mxu0 %vm4349_vm3, %v4347_v3 }
 0x730   :  { %4245 = vmatprep.subr.bf16.mxu0 %v4348_v14 }
 0x733   :  { %4247 = vmatpush3.bf16.msra.mxu0 %v4914_v12 }
 0x734   :  { %4255 = vmatprep.subr.bf16.mxu0 %v4254_v32 }
 0x7f9   :  { %v2587_v7 = vpop.f32.mrb[64].mxu0  ;;  %v2664_v44 = vpop.f32.mrb[68].mxu1 }
 0x7fa   :  { %v2591_v4 = vadd.f32 %v2587_v7, %v5001_v30  ;;  %v2668_v35 = vadd.f32 %v2664_v44, %v5019_v16  ;;  %v3926_v38 = vpop.f32.mrb[65].mxu0  ;;  %v3937_v41 = vpop.f32.mrb[69].mxu1 }
 0x7fc   :  { %v3299_v19 = vmul.f32 -1.442695, %v2591_v4  ;;  %v3301_v12 = vmul.f32 -1.442695, %v2668_v35 }
 0x7fe   :  { %4327 = vpow2.f32 %v3299_v19 }
 0x7ff   :  { %4329 = vpow2.f32 %v3301_v12 }
 0x801   :  { %v2741_v9 = vpop.f32.mrb[66].mxu0 }
 0x802   :  { %v3948_v57 = vpop.f32.mrb[67].mxu0  ;;  %v2742_v28 = vadd.f32 %v5031_v60, %v2741_v9 }
 0x808   :  { %v4328_v61 = vpop.eup %4327 }
 0x809   :  { %v2595_v1 = vadd.f32 1.0, %v4328_v61  ;;  %v4330_v2 = vpop.eup %4329 }
 0x80a   :  { %v2672_v36 = vadd.f32 1.0, %v4330_v2 }
 0x80b   :  { %4331 = vrcp.f32 %v2595_v1 }
 0x80c   :  { %4333 = vrcp.f32 %v2672_v36 }
 0x815   :  { %v4332_v34 = vpop.eup %4331 }
 0x816   :  { %v2745_v30 = vmul.f32 %v4332_v34, %v2742_v28  ;;  %v4334_v5 = vpop.eup %4333 }
 0x817   :  { %v2748_v6 = vsub.f32 1.0, %v4334_v5  ;;  %v2750_v29 = vmul.f32 %v4334_v5, %v2516_v17 }
 0x818   :  { %v2746_v16 = vadd.f32 %v2745_v30, %v5044_v39  ;;  %v2988_v39 = vld [vmem:[#allocation2] sm:$0xff] }
 0x81a   :  { %4335 = vtanh.f32 %v2746_v16 }
 0x824   :  { %v4336_v55 = vpop.eup %4335 }
 0x825   :  { %v2749_v15 = vmul.f32 %v4336_v55, %v2748_v6 }
 0x827   :  { %v5213_v63 = vadd.f32 %v2750_v29, %v2749_v15 }
 0x829   :  { %2752 = vst.msk [vmem:[#allocation2 + $0x30] sm:$0xff] %vm1103_vm4, %v5213_v63  ;;  %3958 = vmatmul.mubr.msk.f32.vlgmr.msra.gmra.mrb[70].mxu1 %vm1103_vm4, %v5213_v63  ;;  %3969 = vmatmul.mubr.msk.f32.vlgmr.msra.gmra.mrb[68].mxu0 %vm1103_vm4, %v5213_v63 }
 0x82a   :  { %4250 = vmatpush3.bf16.msra.mxu1 %v4928_v22  ;;  %4257 = vmatpush3.bf16.msra.mxu0 %v4254_v32  ;;  %v2990_v22 = vld [vmem:[#allocation2 + $0x10] sm:$0xff] }
 0x82b   :  { %3990 = vmatprep.mubr.msk.f32.mxu0 %vm1103_vm4, %v2988_v39  ;;  %4251 = vmatprep.subr.bf16.mxu1 %v4348_v14  ;;  %v2992_v14 = vld [vmem:[#allocation2 + $0x20] sm:$0xff] }
 0x82c   :  { %4259 = vmatprep.subr.bf16.mxu0 %v4258_v25  ;;  %3979 = vmatprep.mubr.msk.f32.mxu1 %vm4349_vm3, %v4347_v3 }
 0x82e   :  { %4253 = vmatpush3.bf16.msra.mxu1 %v4942_v27  ;;  %4261 = vmatpush3.bf16.msra.mxu0 %v4258_v25 }
 0x830   :  { %v2994_v3 = vld [vmem:[#allocation2 + $0x30] sm:$0xff] }
 0x831   :  { %3980 = vmatmul.mubr.msk.f32.vlgmr.msra.gmra.mrb[72].mxu1 %vm1103_vm4, %v5213_v63  ;;  %3991 = vmatmul.mubr.msk.f32.vlgmr.msra.gmra.mrb[70].mxu0 %vm1103_vm4, %v2989_v26 }
 0x832   :  { %3993 = vmatprep.mubr.msk.f32.mxu0 %vm1103_vm4, %v2990_v22 }
 0x835   :  { %3994 = vmatmul.mubr.msk.f32.gmra.mrb[72].mxu0 %vm1103_vm4, %v2991_v40 }
 0x836   :  { %3996 = vmatprep.mubr.msk.f32.mxu0 %vm1103_vm4, %v2992_v14 }
 0x839   :  { %3997 = vmatmul.mubr.msk.f32.gmra.mrb[74].mxu0 %vm1103_vm4, %v2993_v18 }
 0x83a   :  { %3999 = vmatprep.mubr.msk.f32.mxu0 %vm1103_vm4, %v2994_v3 }
 0x8fc   :  { %v2822_v27 = vpop.f32.mrb[70].mxu1  ;;  %v2899_v21 = vpop.f32.mrb[68].mxu0 }
 0x8fd   :  { %v2826_v33 = vadd.f32 %v2822_v27, %v5006_v20  ;;  %v2903_v45 = vadd.f32 %v2899_v21, %v5024_v59  ;;  %v3959_v53 = vpop.f32.mrb[71].mxu1  ;;  %v3970_v51 = vpop.f32.mrb[69].mxu0 }
 0x8ff   :  { %v3304_v8 = vmul.f32 -1.442695, %v2826_v33  ;;  %v3306_v48 = vmul.f32 -1.442695, %v2903_v45 }
 0x901   :  { %4337 = vpow2.f32 %v3304_v8 }
 0x902   :  { %4339 = vpow2.f32 %v3306_v48 }
 0x904   :  { %v2976_v58 = vpop.f32.mrb[72].mxu1  ;;  %v3992_v47 = vpop.f32.mrb[70].mxu0 }
 0x905   :  { %v3103_v62 = vadd.f32 %v3992_v47, %v3308_v31  ;;  %v3981_v23 = vpop.f32.mrb[73].mxu1  ;;  %v3097_v49 = vpop.f32.mrb[71].mxu0  ;;  %v2977_v32 = vadd.f32 %v5031_v60, %v2976_v58 }
 0x906   :  { %v3098_v43 = vadd.f32 %v3308_v31, %v3097_v49 }
 0x907   :  { %3137 = vst [vmem:[%s5276_s7 + $0x8] sm:$0xff] %v3103_v62 }
 0x908   :  { %3136 = vst [vmem:[%s5276_s7] sm:$0xff] %v3098_v43  ;;  %v3995_v20 = vpop.f32.mrb[72].mxu0 }
 0x909   :  { %v3113_v59 = vadd.f32 %v3995_v20, %v3308_v31  ;;  %v3107_v0 = vpop.f32.mrb[73].mxu0 }
 0x90a   :  { %v3108_v10 = vadd.f32 %v3308_v31, %v3107_v0 }
 0x90b   :  { %v4338_v50 = vpop.eup %4337  ;;  %3139 = vst [vmem:[%s5276_s7 + $0x18] sm:$0xff] %v3113_v59 }
 0x90c   :  { %v2830_v24 = vadd.f32 1.0, %v4338_v50  ;;  %3138 = vst [vmem:[%s5276_s7 + $0x10] sm:$0xff] %v3108_v10  ;;  %v3998_v46 = vpop.f32.mrb[74].mxu0  ;;  %v4340_v42 = vpop.eup %4339 }
 0x90d   :  { %v3123_v37 = vadd.f32 %v3998_v46, %v3308_v31  ;;  %v3117_v52 = vpop.f32.mrb[75].mxu0  ;;  %v2907_v56 = vadd.f32 1.0, %v4340_v42 }
 0x90e   :  { %4341 = vrcp.f32 %v2830_v24  ;;  %v3118_v17 = vadd.f32 %v3308_v31, %v3117_v52 }
 0x90f   :  { %3141 = vst [vmem:[%s5276_s7 + $0x28] sm:$0xff] %v3123_v37  ;;  %4343 = vrcp.f32 %v2907_v56 }
 0x910   :  { %3140 = vst [vmem:[%s5276_s7 + $0x20] sm:$0xff] %v3118_v17 }
 0x918   :  { %v4342_v7 = vpop.eup %4341 }
 0x919   :  { %v2980_v44 = vmul.f32 %v4342_v7, %v2977_v32  ;;  %v4344_v35 = vpop.eup %4343 }
 0x91a   :  { %v2983_v38 = vsub.f32 1.0, %v4344_v35  ;;  %v2985_v19 = vmul.f32 %v4344_v35, %v5213_v63 }
 0x91b   :  { %v2981_v4 = vadd.f32 %v2980_v44, %v5042_v54 }
 0x91d   :  { %4345 = vtanh.f32 %v2981_v4 }
 0x927   :  { %v4346_v41 = vpop.eup %4345 }
 0x928   :  { %v2984_v12 = vmul.f32 %v4346_v41, %v2983_v38 }
 0x92a   :  { %v2986_v9 = vadd.f32 %v2985_v19, %v2984_v12 }
 0x92c   :  { %2987 = vst.msk [vmem:[#allocation2 + $0x38] sm:$0xff] %vm1103_vm4, %v2986_v9 }
 0x933   :  { %v2995_v57 = vld [vmem:[#allocation2 + $0x38] sm:$0xff] }
 0x934   :  { %4000 = vmatmul.mubr.msk.f32.gmra.mrb[76].mxu0 %vm1103_vm4, %v2995_v57 }
 0xa07   :  { %v4001_v61 = vpop.f32.mrb[76].mxu0 }
 0xa08   :  { %v3133_v60 = vadd.f32 %v4001_v61, %v3308_v31  ;;  %v3127_v1 = vpop.f32.mrb[77].mxu0 }
 0xa09   :  { %v3128_v2 = vadd.f32 %v3308_v31, %v3127_v1 }
 0xa0a   :  { %3143 = vst [vmem:[%s5276_s7 + $0x38] sm:$0xff] %v3133_v60 }
 0xa0b   :  { %3142 = vst [vmem:[%s5276_s7 + $0x30] sm:$0xff] %v3128_v2 }

</bundles_post_ra>
